<compile_context>
chip_gen: v7x
topology: tpu7x:2x2x1
jax: 0.10.0
libtpu: 0.0.40
codegen_flags: <defaults>
</compile_context>

<pallas_src>
import functools

import jax
import jax.numpy as jnp
import numpy as np
from jax import lax
from jax.experimental import pallas as pl
from jax.experimental.pallas import tpu as pltpu


def _gated_conv_kernel(vx_ref, hx_ref, wv_ref, wh_ref, wvtoh_ref, whtoh_ref,
                       out_ref, *, Wp, OC, half, k, h_dxs):
    """One batch element per grid step.

    Layout: channels on sublanes, flattened padded spatial (length Lpad,
    multiple of 128) on lanes.  Anchor index m = y*Wp + x, so every masked conv
    tap (dy, dx) is a uniform lane shift by dy*Wp + dx (zero-padding in the
    wrapper supplies the out-of-image zeros) and down_shift is a lane roll by
    Wp.  Lanes with x >= W (or y >= H) are garbage and sliced off by the
    wrapper, so circular wrap-around from the rolls is harmless.
    """
    Lpad = vx_ref.shape[-1]
    OC2 = 2 * OC

    vx = vx_ref[0]          # (Cin, Lpad) f32  padded vx, flattened row stride Wp
    hx = hx_ref[0]          # (Cin, Lpad) f32  padded hx

    def tap(img, shift_elems):
        # shifted[m] = img[m + shift_elems]  (circular; only garbage lanes wrap)
        if shift_elems == 0:
            return img
        return pltpu.roll(img, shift=(-shift_elems) % Lpad, axis=1)

    # ----- masked vertical k x k conv (vmask keeps kernel rows 0 .. k//2) -----
    acc_v = jnp.zeros((OC2, Lpad), jnp.float32)
    t = 0
    for dy in range(half + 1):
        for dx in range(k):
            sh = tap(vx, dy * Wp + dx).astype(jnp.bfloat16)
            acc_v = acc_v + jnp.dot(wv_ref[t], sh,
                                    preferred_element_type=jnp.float32)
            t += 1

    # ----- masked horizontal 1 x k conv (hmask keeps cols 0 .. k//2[-1]) -----
    acc_h = jnp.zeros((OC2, Lpad), jnp.float32)
    hres = None
    for ti, dx in enumerate(h_dxs):
        sh = tap(hx, dx)
        if dx == half:
            hres = sh                      # shift by k//2 == the unshifted hx
        acc_h = acc_h + jnp.dot(wh_ref[ti], sh.astype(jnp.bfloat16),
                                preferred_element_type=jnp.float32)
    if hres is None:                       # mask type 'A': dx == k//2 not a tap
        hres = tap(hx, half)

    # ----- down_shift(vertical(vx)): one-image-row lane roll, zero first row --
    rolled = pltpu.roll(acc_v, shift=Wp, axis=1)
    lane = lax.broadcasted_iota(jnp.int32, (OC2, Lpad), 1)
    ds = jnp.where(lane >= Wp, rolled, 0.0)

    # hx_new = horizontal(hx) + vtoh(down_shift(vertical(vx)))
    acc_h = acc_h + jnp.dot(wvtoh_ref[...], ds.astype(jnp.bfloat16),
                            preferred_element_type=jnp.float32)

    # ----- gated tanh * sigmoid (f32 on VPU/EUP; sigmoid via tanh) -----------
    def gate(a, b):
        return jnp.tanh(a) * (0.5 * jnp.tanh(0.5 * b) + 0.5)

    v_gated = gate(acc_v[:OC, :], acc_v[OC:, :])
    h_gated = gate(acc_h[:OC, :], acc_h[OC:, :])

    # hx_out = hx + htoh(h_gated)
    h_out = hres + jnp.dot(whtoh_ref[...], h_gated.astype(jnp.bfloat16),
                           preferred_element_type=jnp.float32)

    # torch.cat((vx, hx), dim=1): write the two channel halves directly.
    out_ref[0, :OC, :] = v_gated.astype(out_ref.dtype)
    out_ref[0, OC:, :] = h_out.astype(out_ref.dtype)


def gated_conv2d(x, w_v, w_h, w_vtoh, w_htoh, mask_type="B", k=7, padding=3):
    """x: (N, 2*Cin, H, W) float32 NCHW.  Weights in PyTorch OIHW layout."""
    assert mask_type in ("A", "B")
    N, C2, H, W = x.shape
    Cin = C2 // 2
    OC2 = w_v.shape[0]
    OC = OC2 // 2
    half = k // 2
    assert padding == half
    assert Cin == OC, "residual hx = hx + htoh(...) requires in_channels == out_channels"

    Wp = W + 2 * half                     # padded row stride
    Lp = (H + half) * Wp                  # flattened padded length
    Lpad = ((Lp + 127) // 128) * 128      # lane-dense (multiple of 128)

    vx = x[:, :Cin]
    hx = x[:, Cin:]

    # Compact padded inputs (no im2col in HBM).  vx gets a `half`-row TOP pad so
    # the masked vertical taps (kernel rows 0..k//2) become non-negative flat
    # shifts; both get `half` left/right pads; flatten with row stride Wp.
    vxp = jnp.pad(vx, ((0, 0), (0, 0), (half, 0), (half, half)))
    hxp = jnp.pad(hx, ((0, 0), (0, 0), (0, half), (half, half)))
    vxf = jnp.pad(vxp.reshape(N, Cin, Lp), ((0, 0), (0, 0), (0, Lpad - Lp)))
    hxf = jnp.pad(hxp.reshape(N, Cin, Lp), ((0, 0), (0, 0), (0, Lpad - Lp)))

    # Per-tap weight matrices (only the masked-in taps), bf16 for the MXU.
    wv_taps = jnp.transpose(w_v[:, :, :half + 1, :], (2, 3, 0, 1)) \
                 .reshape((half + 1) * k, OC2, Cin).astype(jnp.bfloat16)
    h_dxs = tuple(range(half + 1)) if mask_type == "B" else tuple(range(half))
    wh_taps = jnp.transpose(w_h[:, :, 0, :len(h_dxs)], (2, 0, 1)) \
                 .astype(jnp.bfloat16)                     # (keff, 2*OC, Cin)
    wvtoh_m = w_vtoh[:, :, 0, 0].astype(jnp.bfloat16)      # (2*OC, 2*OC)
    whtoh_m = w_htoh[:, :, 0, 0].astype(jnp.bfloat16)      # (OC, OC)

    kern = functools.partial(_gated_conv_kernel, Wp=Wp, OC=OC, half=half, k=k,
                             h_dxs=h_dxs)
    out_flat = pl.pallas_call(
        kern,
        out_shape=jax.ShapeDtypeStruct((N, OC2, Lpad), jnp.float32),
        grid=(N,),
        in_specs=[
            pl.BlockSpec((1, Cin, Lpad), lambda b: (b, 0, 0)),
            pl.BlockSpec((1, Cin, Lpad), lambda b: (b, 0, 0)),
            pl.BlockSpec(((half + 1) * k, OC2, Cin), lambda b: (0, 0, 0)),
            pl.BlockSpec((len(h_dxs), OC2, Cin), lambda b: (0, 0, 0)),
            pl.BlockSpec((OC2, OC2), lambda b: (0, 0)),
            pl.BlockSpec((OC, OC), lambda b: (0, 0)),
        ],
        out_specs=pl.BlockSpec((1, OC2, Lpad), lambda b: (b, 0, 0)),
        compiler_params=pltpu.CompilerParams(
            dimension_semantics=("parallel",)),
    )(vxf, hxf, wv_taps, wh_taps, wvtoh_m, whtoh_m)

    # Anchor m = y*Wp + x  ->  (N, 2*OC, H+half, Wp); valid image at [:H, :W].
    out = out_flat[:, :, :Lp].reshape(N, OC2, H + half, Wp)[:, :, :H, :W]
    return out


def reference_gated_conv2d(x, w_v, w_h, w_vtoh, w_htoh, mask_type="B", k=7, padding=3):
    """Pure-JAX replica of the PyTorch forward (NCHW), f32 HIGHEST precision."""
    half = k // 2
    vmask = jnp.ones_like(w_v).at[:, :, half + 1:, :].set(0.0)
    hmask = jnp.ones_like(w_h).at[:, :, :, half + 1:].set(0.0)
    if mask_type == "A":
        hmask = hmask.at[:, :, :, half].set(0.0)
    wv_m = w_v * vmask
    wh_m = w_h * hmask

    def conv(inp, w, pad):
        return lax.conv_general_dilated(
            inp, w, (1, 1), pad,
            dimension_numbers=("NCHW", "OIHW", "NCHW"),
            precision=lax.Precision.HIGHEST)

    vx, hx = jnp.split(x, 2, axis=1)
    vxc = conv(vx, wv_m, [(padding, padding), (padding, padding)])
    hxc = conv(hx, wh_m, [(0, 0), (padding, padding)])
    dsh = jnp.pad(vxc[:, :, :-1, :], ((0, 0), (0, 0), (1, 0), (0, 0)))
    hxc = hxc + conv(dsh, w_vtoh, [(0, 0), (0, 0)])
    v1, v2 = jnp.split(vxc, 2, axis=1)
    vg = jnp.tanh(v1) * jax.nn.sigmoid(v2)
    h1, h2 = jnp.split(hxc, 2, axis=1)
    hg = jnp.tanh(h1) * jax.nn.sigmoid(h2)
    hout = hx + conv(hg, w_htoh, [(0, 0), (0, 0)])
    return jnp.concatenate([vg, hout], axis=1)


if __name__ == "__main__":
    N, Cin, OC, H, W, k = 2, 4, 4, 16, 16, 7
    key = jax.random.PRNGKey(0)
    k1, k2, k3, k4, k5 = jax.random.split(key, 5)

    x = jax.random.normal(k1, (N, 2 * Cin, H, W), jnp.float32)
    # Deterministic synthetic parameters (shapes from the module's __init__, OIHW).
    w_v = 0.1 * jax.random.normal(k2, (2 * OC, Cin, k, k), jnp.float32)
    w_h = 0.1 * jax.random.normal(k3, (2 * OC, Cin, 1, k), jnp.float32)
    w_vtoh = 0.1 * jax.random.normal(k4, (2 * OC, 2 * OC, 1, 1), jnp.float32)
    w_htoh = 0.1 * jax.random.normal(k5, (OC, OC, 1, 1), jnp.float32)

    out = gated_conv2d(x, w_v, w_h, w_vtoh, w_htoh, mask_type="B", k=k, padding=k // 2)
    out = jax.block_until_ready(out)

    ref = reference_gated_conv2d(x, w_v, w_h, w_vtoh, w_htoh, mask_type="B",
                                 k=k, padding=k // 2)
    # bf16 MXU inputs (per perf review) -> compare at bf16-level tolerance.
    np.testing.assert_allclose(np.asarray(out), np.asarray(ref), atol=2e-2, rtol=2e-2)
    print("KERNEL_OK")
</pallas_src>

<mosaic_0001>
module attributes {stable_mosaic.version = 11 : i64} {
  func.func @_gated_conv_kernel(%arg0: i32, %arg1: memref<1x4x512xf32, #tpu.memory_space<vmem>>, %arg2: memref<1x4x512xf32, #tpu.memory_space<vmem>>, %arg3: memref<28x8x4xbf16, #tpu.memory_space<vmem>>, %arg4: memref<4x8x4xbf16, #tpu.memory_space<vmem>>, %arg5: memref<8x8xbf16, #tpu.memory_space<vmem>>, %arg6: memref<4x4xbf16, #tpu.memory_space<vmem>>, %arg7: memref<1x8x512xf32, #tpu.memory_space<vmem>>) attributes {dimension_semantics = [#tpu.dimension_semantics<parallel>], iteration_bounds = array<i64: 2>, scalar_prefetch = 0 : i64, scratch_operands = 0 : i64, tpu.core_type = #tpu.core_type<tc>, window_params = [{transform_indices = @transform_0, window_bounds = array<i64: 1, 4, 512>}, {transform_indices = @transform_1, window_bounds = array<i64: 1, 4, 512>}, {pipeline_mode = #tpu.pipeline_mode<synchronous>, transform_indices = @transform_2, window_bounds = array<i64: 28, 8, 4>}, {pipeline_mode = #tpu.pipeline_mode<synchronous>, transform_indices = @transform_3, window_bounds = array<i64: 4, 8, 4>}, {pipeline_mode = #tpu.pipeline_mode<synchronous>, transform_indices = @transform_4, window_bounds = array<i64: 8, 8>}, {pipeline_mode = #tpu.pipeline_mode<synchronous>, transform_indices = @transform_5, window_bounds = array<i64: 4, 4>}, {transform_indices = @transform_6, window_bounds = array<i64: 1, 8, 512>}]} {
    %c0 = arith.constant 0 : index
    %c0_0 = arith.constant 0 : index
    %c0_1 = arith.constant 0 : index
    %0 = vector.load %arg1[%c0, %c0_0, %c0_1] : memref<1x4x512xf32, #tpu.memory_space<vmem>>, vector<1x4x512xf32>
    %1 = vector.shape_cast %0 : vector<1x4x512xf32> to vector<4x512xf32>
    %c0_2 = arith.constant 0 : index
    %c0_3 = arith.constant 0 : index
    %c0_4 = arith.constant 0 : index
    %2 = vector.load %arg2[%c0_2, %c0_3, %c0_4] : memref<1x4x512xf32, #tpu.memory_space<vmem>>, vector<1x4x512xf32>
    %3 = vector.shape_cast %2 : vector<1x4x512xf32> to vector<4x512xf32>
    %cst = arith.constant 0.000000e+00 : f32
    %4 = vector.broadcast %cst : f32 to vector<8x512xf32>
    %5 = arith.truncf %1 : vector<4x512xf32> to vector<4x512xbf16>
    %c0_5 = arith.constant 0 : index
    %c0_6 = arith.constant 0 : index
    %c0_7 = arith.constant 0 : index
    %6 = vector.load %arg3[%c0_5, %c0_6, %c0_7] : memref<28x8x4xbf16, #tpu.memory_space<vmem>>, vector<1x8x4xbf16>
    %7 = vector.shape_cast %6 : vector<1x8x4xbf16> to vector<8x4xbf16>
    %cst_8 = arith.constant dense<0.000000e+00> : vector<8x512xf32>
    %8 = tpu.matmul %7, %5, %cst_8 {dimension_numbers = #tpu.dot_dimension_numbers<[1], [0], [0], [1], [0, 0, 1, 1], [], []>} : vector<8x4xbf16>, vector<4x512xbf16>, vector<8x512xf32> -> vector<8x512xf32>
    %9 = arith.addf %4, %8 : vector<8x512xf32>
    %c511_i32 = arith.constant 511 : i32
    %10 = tpu.dynamic_rotate %1 by %c511_i32 dim 1 : vector<4x512xf32>, i32 -> vector<4x512xf32>
    %11 = arith.truncf %10 : vector<4x512xf32> to vector<4x512xbf16>
    %c1 = arith.constant 1 : index
    %c0_9 = arith.constant 0 : index
    %c0_10 = arith.constant 0 : index
    %12 = vector.load %arg3[%c1, %c0_9, %c0_10] : memref<28x8x4xbf16, #tpu.memory_space<vmem>>, vector<1x8x4xbf16>
    %13 = vector.shape_cast %12 : vector<1x8x4xbf16> to vector<8x4xbf16>
    %cst_11 = arith.constant dense<0.000000e+00> : vector<8x512xf32>
    %14 = tpu.matmul %13, %11, %cst_11 {dimension_numbers = #tpu.dot_dimension_numbers<[1], [0], [0], [1], [0, 0, 1, 1], [], []>} : vector<8x4xbf16>, vector<4x512xbf16>, vector<8x512xf32> -> vector<8x512xf32>
    %15 = arith.addf %9, %14 : vector<8x512xf32>
    %c510_i32 = arith.constant 510 : i32
    %16 = tpu.dynamic_rotate %1 by %c510_i32 dim 1 : vector<4x512xf32>, i32 -> vector<4x512xf32>
    %17 = arith.truncf %16 : vector<4x512xf32> to vector<4x512xbf16>
    %c2 = arith.constant 2 : index
    %c0_12 = arith.constant 0 : index
    %c0_13 = arith.constant 0 : index
    %18 = vector.load %arg3[%c2, %c0_12, %c0_13] : memref<28x8x4xbf16, #tpu.memory_space<vmem>>, vector<1x8x4xbf16>
    %19 = vector.shape_cast %18 : vector<1x8x4xbf16> to vector<8x4xbf16>
    %cst_14 = arith.constant dense<0.000000e+00> : vector<8x512xf32>
    %20 = tpu.matmul %19, %17, %cst_14 {dimension_numbers = #tpu.dot_dimension_numbers<[1], [0], [0], [1], [0, 0, 1, 1], [], []>} : vector<8x4xbf16>, vector<4x512xbf16>, vector<8x512xf32> -> vector<8x512xf32>
    %21 = arith.addf %15, %20 : vector<8x512xf32>
    %c509_i32 = arith.constant 509 : i32
    %22 = tpu.dynamic_rotate %1 by %c509_i32 dim 1 : vector<4x512xf32>, i32 -> vector<4x512xf32>
    %23 = arith.truncf %22 : vector<4x512xf32> to vector<4x512xbf16>
    %c3 = arith.constant 3 : index
    %c0_15 = arith.constant 0 : index
    %c0_16 = arith.constant 0 : index
    %24 = vector.load %arg3[%c3, %c0_15, %c0_16] : memref<28x8x4xbf16, #tpu.memory_space<vmem>>, vector<1x8x4xbf16>
    %25 = vector.shape_cast %24 : vector<1x8x4xbf16> to vector<8x4xbf16>
    %cst_17 = arith.constant dense<0.000000e+00> : vector<8x512xf32>
    %26 = tpu.matmul %25, %23, %cst_17 {dimension_numbers = #tpu.dot_dimension_numbers<[1], [0], [0], [1], [0, 0, 1, 1], [], []>} : vector<8x4xbf16>, vector<4x512xbf16>, vector<8x512xf32> -> vector<8x512xf32>
    %27 = arith.addf %21, %26 : vector<8x512xf32>
    %c508_i32 = arith.constant 508 : i32
    %28 = tpu.dynamic_rotate %1 by %c508_i32 dim 1 : vector<4x512xf32>, i32 -> vector<4x512xf32>
    %29 = arith.truncf %28 : vector<4x512xf32> to vector<4x512xbf16>
    %c4 = arith.constant 4 : index
    %c0_18 = arith.constant 0 : index
    %c0_19 = arith.constant 0 : index
    %30 = vector.load %arg3[%c4, %c0_18, %c0_19] : memref<28x8x4xbf16, #tpu.memory_space<vmem>>, vector<1x8x4xbf16>
    %31 = vector.shape_cast %30 : vector<1x8x4xbf16> to vector<8x4xbf16>
    %cst_20 = arith.constant dense<0.000000e+00> : vector<8x512xf32>
    %32 = tpu.matmul %31, %29, %cst_20 {dimension_numbers = #tpu.dot_dimension_numbers<[1], [0], [0], [1], [0, 0, 1, 1], [], []>} : vector<8x4xbf16>, vector<4x512xbf16>, vector<8x512xf32> -> vector<8x512xf32>
    %33 = arith.addf %27, %32 : vector<8x512xf32>
    %c507_i32 = arith.constant 507 : i32
    %34 = tpu.dynamic_rotate %1 by %c507_i32 dim 1 : vector<4x512xf32>, i32 -> vector<4x512xf32>
    %35 = arith.truncf %34 : vector<4x512xf32> to vector<4x512xbf16>
    %c5 = arith.constant 5 : index
    %c0_21 = arith.constant 0 : index
    %c0_22 = arith.constant 0 : index
    %36 = vector.load %arg3[%c5, %c0_21, %c0_22] : memref<28x8x4xbf16, #tpu.memory_space<vmem>>, vector<1x8x4xbf16>
    %37 = vector.shape_cast %36 : vector<1x8x4xbf16> to vector<8x4xbf16>
    %cst_23 = arith.constant dense<0.000000e+00> : vector<8x512xf32>
    %38 = tpu.matmul %37, %35, %cst_23 {dimension_numbers = #tpu.dot_dimension_numbers<[1], [0], [0], [1], [0, 0, 1, 1], [], []>} : vector<8x4xbf16>, vector<4x512xbf16>, vector<8x512xf32> -> vector<8x512xf32>
    %39 = arith.addf %33, %38 : vector<8x512xf32>
    %c506_i32 = arith.constant 506 : i32
    %40 = tpu.dynamic_rotate %1 by %c506_i32 dim 1 : vector<4x512xf32>, i32 -> vector<4x512xf32>
    %41 = arith.truncf %40 : vector<4x512xf32> to vector<4x512xbf16>
    %c6 = arith.constant 6 : index
    %c0_24 = arith.constant 0 : index
    %c0_25 = arith.constant 0 : index
    %42 = vector.load %arg3[%c6, %c0_24, %c0_25] : memref<28x8x4xbf16, #tpu.memory_space<vmem>>, vector<1x8x4xbf16>
    %43 = vector.shape_cast %42 : vector<1x8x4xbf16> to vector<8x4xbf16>
    %cst_26 = arith.constant dense<0.000000e+00> : vector<8x512xf32>
    %44 = tpu.matmul %43, %41, %cst_26 {dimension_numbers = #tpu.dot_dimension_numbers<[1], [0], [0], [1], [0, 0, 1, 1], [], []>} : vector<8x4xbf16>, vector<4x512xbf16>, vector<8x512xf32> -> vector<8x512xf32>
    %45 = arith.addf %39, %44 : vector<8x512xf32>
    %c490_i32 = arith.constant 490 : i32
    %46 = tpu.dynamic_rotate %1 by %c490_i32 dim 1 : vector<4x512xf32>, i32 -> vector<4x512xf32>
    %47 = arith.truncf %46 : vector<4x512xf32> to vector<4x512xbf16>
    %c7 = arith.constant 7 : index
    %c0_27 = arith.constant 0 : index
    %c0_28 = arith.constant 0 : index
    %48 = vector.load %arg3[%c7, %c0_27, %c0_28] : memref<28x8x4xbf16, #tpu.memory_space<vmem>>, vector<1x8x4xbf16>
    %49 = vector.shape_cast %48 : vector<1x8x4xbf16> to vector<8x4xbf16>
    %cst_29 = arith.constant dense<0.000000e+00> : vector<8x512xf32>
    %50 = tpu.matmul %49, %47, %cst_29 {dimension_numbers = #tpu.dot_dimension_numbers<[1], [0], [0], [1], [0, 0, 1, 1], [], []>} : vector<8x4xbf16>, vector<4x512xbf16>, vector<8x512xf32> -> vector<8x512xf32>
    %51 = arith.addf %45, %50 : vector<8x512xf32>
    %c489_i32 = arith.constant 489 : i32
    %52 = tpu.dynamic_rotate %1 by %c489_i32 dim 1 : vector<4x512xf32>, i32 -> vector<4x512xf32>
    %53 = arith.truncf %52 : vector<4x512xf32> to vector<4x512xbf16>
    %c8 = arith.constant 8 : index
    %c0_30 = arith.constant 0 : index
    %c0_31 = arith.constant 0 : index
    %54 = vector.load %arg3[%c8, %c0_30, %c0_31] : memref<28x8x4xbf16, #tpu.memory_space<vmem>>, vector<1x8x4xbf16>
    %55 = vector.shape_cast %54 : vector<1x8x4xbf16> to vector<8x4xbf16>
    %cst_32 = arith.constant dense<0.000000e+00> : vector<8x512xf32>
    %56 = tpu.matmul %55, %53, %cst_32 {dimension_numbers = #tpu.dot_dimension_numbers<[1], [0], [0], [1], [0, 0, 1, 1], [], []>} : vector<8x4xbf16>, vector<4x512xbf16>, vector<8x512xf32> -> vector<8x512xf32>
    %57 = arith.addf %51, %56 : vector<8x512xf32>
    %c488_i32 = arith.constant 488 : i32
    %58 = tpu.dynamic_rotate %1 by %c488_i32 dim 1 : vector<4x512xf32>, i32 -> vector<4x512xf32>
    %59 = arith.truncf %58 : vector<4x512xf32> to vector<4x512xbf16>
    %c9 = arith.constant 9 : index
    %c0_33 = arith.constant 0 : index
    %c0_34 = arith.constant 0 : index
    %60 = vector.load %arg3[%c9, %c0_33, %c0_34] : memref<28x8x4xbf16, #tpu.memory_space<vmem>>, vector<1x8x4xbf16>
    %61 = vector.shape_cast %60 : vector<1x8x4xbf16> to vector<8x4xbf16>
    %cst_35 = arith.constant dense<0.000000e+00> : vector<8x512xf32>
    %62 = tpu.matmul %61, %59, %cst_35 {dimension_numbers = #tpu.dot_dimension_numbers<[1], [0], [0], [1], [0, 0, 1, 1], [], []>} : vector<8x4xbf16>, vector<4x512xbf16>, vector<8x512xf32> -> vector<8x512xf32>
    %63 = arith.addf %57, %62 : vector<8x512xf32>
    %c487_i32 = arith.constant 487 : i32
    %64 = tpu.dynamic_rotate %1 by %c487_i32 dim 1 : vector<4x512xf32>, i32 -> vector<4x512xf32>
    %65 = arith.truncf %64 : vector<4x512xf32> to vector<4x512xbf16>
    %c10 = arith.constant 10 : index
    %c0_36 = arith.constant 0 : index
    %c0_37 = arith.constant 0 : index
    %66 = vector.load %arg3[%c10, %c0_36, %c0_37] : memref<28x8x4xbf16, #tpu.memory_space<vmem>>, vector<1x8x4xbf16>
    %67 = vector.shape_cast %66 : vector<1x8x4xbf16> to vector<8x4xbf16>
    %cst_38 = arith.constant dense<0.000000e+00> : vector<8x512xf32>
    %68 = tpu.matmul %67, %65, %cst_38 {dimension_numbers = #tpu.dot_dimension_numbers<[1], [0], [0], [1], [0, 0, 1, 1], [], []>} : vector<8x4xbf16>, vector<4x512xbf16>, vector<8x512xf32> -> vector<8x512xf32>
    %69 = arith.addf %63, %68 : vector<8x512xf32>
    %c486_i32 = arith.constant 486 : i32
    %70 = tpu.dynamic_rotate %1 by %c486_i32 dim 1 : vector<4x512xf32>, i32 -> vector<4x512xf32>
    %71 = arith.truncf %70 : vector<4x512xf32> to vector<4x512xbf16>
    %c11 = arith.constant 11 : index
    %c0_39 = arith.constant 0 : index
    %c0_40 = arith.constant 0 : index
    %72 = vector.load %arg3[%c11, %c0_39, %c0_40] : memref<28x8x4xbf16, #tpu.memory_space<vmem>>, vector<1x8x4xbf16>
    %73 = vector.shape_cast %72 : vector<1x8x4xbf16> to vector<8x4xbf16>
    %cst_41 = arith.constant dense<0.000000e+00> : vector<8x512xf32>
    %74 = tpu.matmul %73, %71, %cst_41 {dimension_numbers = #tpu.dot_dimension_numbers<[1], [0], [0], [1], [0, 0, 1, 1], [], []>} : vector<8x4xbf16>, vector<4x512xbf16>, vector<8x512xf32> -> vector<8x512xf32>
    %75 = arith.addf %69, %74 : vector<8x512xf32>
    %c485_i32 = arith.constant 485 : i32
    %76 = tpu.dynamic_rotate %1 by %c485_i32 dim 1 : vector<4x512xf32>, i32 -> vector<4x512xf32>
    %77 = arith.truncf %76 : vector<4x512xf32> to vector<4x512xbf16>
    %c12 = arith.constant 12 : index
    %c0_42 = arith.constant 0 : index
    %c0_43 = arith.constant 0 : index
    %78 = vector.load %arg3[%c12, %c0_42, %c0_43] : memref<28x8x4xbf16, #tpu.memory_space<vmem>>, vector<1x8x4xbf16>
    %79 = vector.shape_cast %78 : vector<1x8x4xbf16> to vector<8x4xbf16>
    %cst_44 = arith.constant dense<0.000000e+00> : vector<8x512xf32>
    %80 = tpu.matmul %79, %77, %cst_44 {dimension_numbers = #tpu.dot_dimension_numbers<[1], [0], [0], [1], [0, 0, 1, 1], [], []>} : vector<8x4xbf16>, vector<4x512xbf16>, vector<8x512xf32> -> vector<8x512xf32>
    %81 = arith.addf %75, %80 : vector<8x512xf32>
    %c484_i32 = arith.constant 484 : i32
    %82 = tpu.dynamic_rotate %1 by %c484_i32 dim 1 : vector<4x512xf32>, i32 -> vector<4x512xf32>
    %83 = arith.truncf %82 : vector<4x512xf32> to vector<4x512xbf16>
    %c13 = arith.constant 13 : index
    %c0_45 = arith.constant 0 : index
    %c0_46 = arith.constant 0 : index
    %84 = vector.load %arg3[%c13, %c0_45, %c0_46] : memref<28x8x4xbf16, #tpu.memory_space<vmem>>, vector<1x8x4xbf16>
    %85 = vector.shape_cast %84 : vector<1x8x4xbf16> to vector<8x4xbf16>
    %cst_47 = arith.constant dense<0.000000e+00> : vector<8x512xf32>
    %86 = tpu.matmul %85, %83, %cst_47 {dimension_numbers = #tpu.dot_dimension_numbers<[1], [0], [0], [1], [0, 0, 1, 1], [], []>} : vector<8x4xbf16>, vector<4x512xbf16>, vector<8x512xf32> -> vector<8x512xf32>
    %87 = arith.addf %81, %86 : vector<8x512xf32>
    %c468_i32 = arith.constant 468 : i32
    %88 = tpu.dynamic_rotate %1 by %c468_i32 dim 1 : vector<4x512xf32>, i32 -> vector<4x512xf32>
    %89 = arith.truncf %88 : vector<4x512xf32> to vector<4x512xbf16>
    %c14 = arith.constant 14 : index
    %c0_48 = arith.constant 0 : index
    %c0_49 = arith.constant 0 : index
    %90 = vector.load %arg3[%c14, %c0_48, %c0_49] : memref<28x8x4xbf16, #tpu.memory_space<vmem>>, vector<1x8x4xbf16>
    %91 = vector.shape_cast %90 : vector<1x8x4xbf16> to vector<8x4xbf16>
    %cst_50 = arith.constant dense<0.000000e+00> : vector<8x512xf32>
    %92 = tpu.matmul %91, %89, %cst_50 {dimension_numbers = #tpu.dot_dimension_numbers<[1], [0], [0], [1], [0, 0, 1, 1], [], []>} : vector<8x4xbf16>, vector<4x512xbf16>, vector<8x512xf32> -> vector<8x512xf32>
    %93 = arith.addf %87, %92 : vector<8x512xf32>
    %c467_i32 = arith.constant 467 : i32
    %94 = tpu.dynamic_rotate %1 by %c467_i32 dim 1 : vector<4x512xf32>, i32 -> vector<4x512xf32>
    %95 = arith.truncf %94 : vector<4x512xf32> to vector<4x512xbf16>
    %c15 = arith.constant 15 : index
    %c0_51 = arith.constant 0 : index
    %c0_52 = arith.constant 0 : index
    %96 = vector.load %arg3[%c15, %c0_51, %c0_52] : memref<28x8x4xbf16, #tpu.memory_space<vmem>>, vector<1x8x4xbf16>
    %97 = vector.shape_cast %96 : vector<1x8x4xbf16> to vector<8x4xbf16>
    %cst_53 = arith.constant dense<0.000000e+00> : vector<8x512xf32>
    %98 = tpu.matmul %97, %95, %cst_53 {dimension_numbers = #tpu.dot_dimension_numbers<[1], [0], [0], [1], [0, 0, 1, 1], [], []>} : vector<8x4xbf16>, vector<4x512xbf16>, vector<8x512xf32> -> vector<8x512xf32>
    %99 = arith.addf %93, %98 : vector<8x512xf32>
    %c466_i32 = arith.constant 466 : i32
    %100 = tpu.dynamic_rotate %1 by %c466_i32 dim 1 : vector<4x512xf32>, i32 -> vector<4x512xf32>
    %101 = arith.truncf %100 : vector<4x512xf32> to vector<4x512xbf16>
    %c16 = arith.constant 16 : index
    %c0_54 = arith.constant 0 : index
    %c0_55 = arith.constant 0 : index
    %102 = vector.load %arg3[%c16, %c0_54, %c0_55] : memref<28x8x4xbf16, #tpu.memory_space<vmem>>, vector<1x8x4xbf16>
    %103 = vector.shape_cast %102 : vector<1x8x4xbf16> to vector<8x4xbf16>
    %cst_56 = arith.constant dense<0.000000e+00> : vector<8x512xf32>
    %104 = tpu.matmul %103, %101, %cst_56 {dimension_numbers = #tpu.dot_dimension_numbers<[1], [0], [0], [1], [0, 0, 1, 1], [], []>} : vector<8x4xbf16>, vector<4x512xbf16>, vector<8x512xf32> -> vector<8x512xf32>
    %105 = arith.addf %99, %104 : vector<8x512xf32>
    %c465_i32 = arith.constant 465 : i32
    %106 = tpu.dynamic_rotate %1 by %c465_i32 dim 1 : vector<4x512xf32>, i32 -> vector<4x512xf32>
    %107 = arith.truncf %106 : vector<4x512xf32> to vector<4x512xbf16>
    %c17 = arith.constant 17 : index
    %c0_57 = arith.constant 0 : index
    %c0_58 = arith.constant 0 : index
    %108 = vector.load %arg3[%c17, %c0_57, %c0_58] : memref<28x8x4xbf16, #tpu.memory_space<vmem>>, vector<1x8x4xbf16>
    %109 = vector.shape_cast %108 : vector<1x8x4xbf16> to vector<8x4xbf16>
    %cst_59 = arith.constant dense<0.000000e+00> : vector<8x512xf32>
    %110 = tpu.matmul %109, %107, %cst_59 {dimension_numbers = #tpu.dot_dimension_numbers<[1], [0], [0], [1], [0, 0, 1, 1], [], []>} : vector<8x4xbf16>, vector<4x512xbf16>, vector<8x512xf32> -> vector<8x512xf32>
    %111 = arith.addf %105, %110 : vector<8x512xf32>
    %c464_i32 = arith.constant 464 : i32
    %112 = tpu.dynamic_rotate %1 by %c464_i32 dim 1 : vector<4x512xf32>, i32 -> vector<4x512xf32>
    %113 = arith.truncf %112 : vector<4x512xf32> to vector<4x512xbf16>
    %c18 = arith.constant 18 : index
    %c0_60 = arith.constant 0 : index
    %c0_61 = arith.constant 0 : index
    %114 = vector.load %arg3[%c18, %c0_60, %c0_61] : memref<28x8x4xbf16, #tpu.memory_space<vmem>>, vector<1x8x4xbf16>
    %115 = vector.shape_cast %114 : vector<1x8x4xbf16> to vector<8x4xbf16>
    %cst_62 = arith.constant dense<0.000000e+00> : vector<8x512xf32>
    %116 = tpu.matmul %115, %113, %cst_62 {dimension_numbers = #tpu.dot_dimension_numbers<[1], [0], [0], [1], [0, 0, 1, 1], [], []>} : vector<8x4xbf16>, vector<4x512xbf16>, vector<8x512xf32> -> vector<8x512xf32>
    %117 = arith.addf %111, %116 : vector<8x512xf32>
    %c463_i32 = arith.constant 463 : i32
    %118 = tpu.dynamic_rotate %1 by %c463_i32 dim 1 : vector<4x512xf32>, i32 -> vector<4x512xf32>
    %119 = arith.truncf %118 : vector<4x512xf32> to vector<4x512xbf16>
    %c19 = arith.constant 19 : index
    %c0_63 = arith.constant 0 : index
    %c0_64 = arith.constant 0 : index
    %120 = vector.load %arg3[%c19, %c0_63, %c0_64] : memref<28x8x4xbf16, #tpu.memory_space<vmem>>, vector<1x8x4xbf16>
    %121 = vector.shape_cast %120 : vector<1x8x4xbf16> to vector<8x4xbf16>
    %cst_65 = arith.constant dense<0.000000e+00> : vector<8x512xf32>
    %122 = tpu.matmul %121, %119, %cst_65 {dimension_numbers = #tpu.dot_dimension_numbers<[1], [0], [0], [1], [0, 0, 1, 1], [], []>} : vector<8x4xbf16>, vector<4x512xbf16>, vector<8x512xf32> -> vector<8x512xf32>
    %123 = arith.addf %117, %122 : vector<8x512xf32>
    %c462_i32 = arith.constant 462 : i32
    %124 = tpu.dynamic_rotate %1 by %c462_i32 dim 1 : vector<4x512xf32>, i32 -> vector<4x512xf32>
    %125 = arith.truncf %124 : vector<4x512xf32> to vector<4x512xbf16>
    %c20 = arith.constant 20 : index
    %c0_66 = arith.constant 0 : index
    %c0_67 = arith.constant 0 : index
    %126 = vector.load %arg3[%c20, %c0_66, %c0_67] : memref<28x8x4xbf16, #tpu.memory_space<vmem>>, vector<1x8x4xbf16>
    %127 = vector.shape_cast %126 : vector<1x8x4xbf16> to vector<8x4xbf16>
    %cst_68 = arith.constant dense<0.000000e+00> : vector<8x512xf32>
    %128 = tpu.matmul %127, %125, %cst_68 {dimension_numbers = #tpu.dot_dimension_numbers<[1], [0], [0], [1], [0, 0, 1, 1], [], []>} : vector<8x4xbf16>, vector<4x512xbf16>, vector<8x512xf32> -> vector<8x512xf32>
    %129 = arith.addf %123, %128 : vector<8x512xf32>
    %c446_i32 = arith.constant 446 : i32
    %130 = tpu.dynamic_rotate %1 by %c446_i32 dim 1 : vector<4x512xf32>, i32 -> vector<4x512xf32>
    %131 = arith.truncf %130 : vector<4x512xf32> to vector<4x512xbf16>
    %c21 = arith.constant 21 : index
    %c0_69 = arith.constant 0 : index
    %c0_70 = arith.constant 0 : index
    %132 = vector.load %arg3[%c21, %c0_69, %c0_70] : memref<28x8x4xbf16, #tpu.memory_space<vmem>>, vector<1x8x4xbf16>
    %133 = vector.shape_cast %132 : vector<1x8x4xbf16> to vector<8x4xbf16>
    %cst_71 = arith.constant dense<0.000000e+00> : vector<8x512xf32>
    %134 = tpu.matmul %133, %131, %cst_71 {dimension_numbers = #tpu.dot_dimension_numbers<[1], [0], [0], [1], [0, 0, 1, 1], [], []>} : vector<8x4xbf16>, vector<4x512xbf16>, vector<8x512xf32> -> vector<8x512xf32>
    %135 = arith.addf %129, %134 : vector<8x512xf32>
    %c445_i32 = arith.constant 445 : i32
    %136 = tpu.dynamic_rotate %1 by %c445_i32 dim 1 : vector<4x512xf32>, i32 -> vector<4x512xf32>
    %137 = arith.truncf %136 : vector<4x512xf32> to vector<4x512xbf16>
    %c22 = arith.constant 22 : index
    %c0_72 = arith.constant 0 : index
    %c0_73 = arith.constant 0 : index
    %138 = vector.load %arg3[%c22, %c0_72, %c0_73] : memref<28x8x4xbf16, #tpu.memory_space<vmem>>, vector<1x8x4xbf16>
    %139 = vector.shape_cast %138 : vector<1x8x4xbf16> to vector<8x4xbf16>
    %cst_74 = arith.constant dense<0.000000e+00> : vector<8x512xf32>
    %140 = tpu.matmul %139, %137, %cst_74 {dimension_numbers = #tpu.dot_dimension_numbers<[1], [0], [0], [1], [0, 0, 1, 1], [], []>} : vector<8x4xbf16>, vector<4x512xbf16>, vector<8x512xf32> -> vector<8x512xf32>
    %141 = arith.addf %135, %140 : vector<8x512xf32>
    %c444_i32 = arith.constant 444 : i32
    %142 = tpu.dynamic_rotate %1 by %c444_i32 dim 1 : vector<4x512xf32>, i32 -> vector<4x512xf32>
    %143 = arith.truncf %142 : vector<4x512xf32> to vector<4x512xbf16>
    %c23 = arith.constant 23 : index
    %c0_75 = arith.constant 0 : index
    %c0_76 = arith.constant 0 : index
    %144 = vector.load %arg3[%c23, %c0_75, %c0_76] : memref<28x8x4xbf16, #tpu.memory_space<vmem>>, vector<1x8x4xbf16>
    %145 = vector.shape_cast %144 : vector<1x8x4xbf16> to vector<8x4xbf16>
    %cst_77 = arith.constant dense<0.000000e+00> : vector<8x512xf32>
    %146 = tpu.matmul %145, %143, %cst_77 {dimension_numbers = #tpu.dot_dimension_numbers<[1], [0], [0], [1], [0, 0, 1, 1], [], []>} : vector<8x4xbf16>, vector<4x512xbf16>, vector<8x512xf32> -> vector<8x512xf32>
    %147 = arith.addf %141, %146 : vector<8x512xf32>
    %c443_i32 = arith.constant 443 : i32
    %148 = tpu.dynamic_rotate %1 by %c443_i32 dim 1 : vector<4x512xf32>, i32 -> vector<4x512xf32>
    %149 = arith.truncf %148 : vector<4x512xf32> to vector<4x512xbf16>
    %c24 = arith.constant 24 : index
    %c0_78 = arith.constant 0 : index
    %c0_79 = arith.constant 0 : index
    %150 = vector.load %arg3[%c24, %c0_78, %c0_79] : memref<28x8x4xbf16, #tpu.memory_space<vmem>>, vector<1x8x4xbf16>
    %151 = vector.shape_cast %150 : vector<1x8x4xbf16> to vector<8x4xbf16>
    %cst_80 = arith.constant dense<0.000000e+00> : vector<8x512xf32>
    %152 = tpu.matmul %151, %149, %cst_80 {dimension_numbers = #tpu.dot_dimension_numbers<[1], [0], [0], [1], [0, 0, 1, 1], [], []>} : vector<8x4xbf16>, vector<4x512xbf16>, vector<8x512xf32> -> vector<8x512xf32>
    %153 = arith.addf %147, %152 : vector<8x512xf32>
    %c442_i32 = arith.constant 442 : i32
    %154 = tpu.dynamic_rotate %1 by %c442_i32 dim 1 : vector<4x512xf32>, i32 -> vector<4x512xf32>
    %155 = arith.truncf %154 : vector<4x512xf32> to vector<4x512xbf16>
    %c25 = arith.constant 25 : index
    %c0_81 = arith.constant 0 : index
    %c0_82 = arith.constant 0 : index
    %156 = vector.load %arg3[%c25, %c0_81, %c0_82] : memref<28x8x4xbf16, #tpu.memory_space<vmem>>, vector<1x8x4xbf16>
    %157 = vector.shape_cast %156 : vector<1x8x4xbf16> to vector<8x4xbf16>
    %cst_83 = arith.constant dense<0.000000e+00> : vector<8x512xf32>
    %158 = tpu.matmul %157, %155, %cst_83 {dimension_numbers = #tpu.dot_dimension_numbers<[1], [0], [0], [1], [0, 0, 1, 1], [], []>} : vector<8x4xbf16>, vector<4x512xbf16>, vector<8x512xf32> -> vector<8x512xf32>
    %159 = arith.addf %153, %158 : vector<8x512xf32>
    %c441_i32 = arith.constant 441 : i32
    %160 = tpu.dynamic_rotate %1 by %c441_i32 dim 1 : vector<4x512xf32>, i32 -> vector<4x512xf32>
    %161 = arith.truncf %160 : vector<4x512xf32> to vector<4x512xbf16>
    %c26 = arith.constant 26 : index
    %c0_84 = arith.constant 0 : index
    %c0_85 = arith.constant 0 : index
    %162 = vector.load %arg3[%c26, %c0_84, %c0_85] : memref<28x8x4xbf16, #tpu.memory_space<vmem>>, vector<1x8x4xbf16>
    %163 = vector.shape_cast %162 : vector<1x8x4xbf16> to vector<8x4xbf16>
    %cst_86 = arith.constant dense<0.000000e+00> : vector<8x512xf32>
    %164 = tpu.matmul %163, %161, %cst_86 {dimension_numbers = #tpu.dot_dimension_numbers<[1], [0], [0], [1], [0, 0, 1, 1], [], []>} : vector<8x4xbf16>, vector<4x512xbf16>, vector<8x512xf32> -> vector<8x512xf32>
    %165 = arith.addf %159, %164 : vector<8x512xf32>
    %c440_i32 = arith.constant 440 : i32
    %166 = tpu.dynamic_rotate %1 by %c440_i32 dim 1 : vector<4x512xf32>, i32 -> vector<4x512xf32>
    %167 = arith.truncf %166 : vector<4x512xf32> to vector<4x512xbf16>
    %c27 = arith.constant 27 : index
    %c0_87 = arith.constant 0 : index
    %c0_88 = arith.constant 0 : index
    %168 = vector.load %arg3[%c27, %c0_87, %c0_88] : memref<28x8x4xbf16, #tpu.memory_space<vmem>>, vector<1x8x4xbf16>
    %169 = vector.shape_cast %168 : vector<1x8x4xbf16> to vector<8x4xbf16>
    %cst_89 = arith.constant dense<0.000000e+00> : vector<8x512xf32>
    %170 = tpu.matmul %169, %167, %cst_89 {dimension_numbers = #tpu.dot_dimension_numbers<[1], [0], [0], [1], [0, 0, 1, 1], [], []>} : vector<8x4xbf16>, vector<4x512xbf16>, vector<8x512xf32> -> vector<8x512xf32>
    %171 = arith.addf %165, %170 : vector<8x512xf32>
    %cst_90 = arith.constant 0.000000e+00 : f32
    %172 = vector.broadcast %cst_90 : f32 to vector<8x512xf32>
    %c0_91 = arith.constant 0 : index
    %c0_92 = arith.constant 0 : index
    %c0_93 = arith.constant 0 : index
    %173 = vector.load %arg4[%c0_91, %c0_92, %c0_93] : memref<4x8x4xbf16, #tpu.memory_space<vmem>>, vector<1x8x4xbf16>
    %174 = vector.shape_cast %173 : vector<1x8x4xbf16> to vector<8x4xbf16>
    %175 = arith.truncf %3 : vector<4x512xf32> to vector<4x512xbf16>
    %cst_94 = arith.constant dense<0.000000e+00> : vector<8x512xf32>
    %176 = tpu.matmul %174, %175, %cst_94 {dimension_numbers = #tpu.dot_dimension_numbers<[1], [0], [0], [1], [0, 0, 1, 1], [], []>} : vector<8x4xbf16>, vector<4x512xbf16>, vector<8x512xf32> -> vector<8x512xf32>
    %177 = arith.addf %172, %176 : vector<8x512xf32>
    %c511_i32_95 = arith.constant 511 : i32
    %178 = tpu.dynamic_rotate %3 by %c511_i32_95 dim 1 : vector<4x512xf32>, i32 -> vector<4x512xf32>
    %c1_96 = arith.constant 1 : index
    %c0_97 = arith.constant 0 : index
    %c0_98 = arith.constant 0 : index
    %179 = vector.load %arg4[%c1_96, %c0_97, %c0_98] : memref<4x8x4xbf16, #tpu.memory_space<vmem>>, vector<1x8x4xbf16>
    %180 = vector.shape_cast %179 : vector<1x8x4xbf16> to vector<8x4xbf16>
    %181 = arith.truncf %178 : vector<4x512xf32> to vector<4x512xbf16>
    %cst_99 = arith.constant dense<0.000000e+00> : vector<8x512xf32>
    %182 = tpu.matmul %180, %181, %cst_99 {dimension_numbers = #tpu.dot_dimension_numbers<[1], [0], [0], [1], [0, 0, 1, 1], [], []>} : vector<8x4xbf16>, vector<4x512xbf16>, vector<8x512xf32> -> vector<8x512xf32>
    %183 = arith.addf %177, %182 : vector<8x512xf32>
    %c510_i32_100 = arith.constant 510 : i32
    %184 = tpu.dynamic_rotate %3 by %c510_i32_100 dim 1 : vector<4x512xf32>, i32 -> vector<4x512xf32>
    %c2_101 = arith.constant 2 : index
    %c0_102 = arith.constant 0 : index
    %c0_103 = arith.constant 0 : index
    %185 = vector.load %arg4[%c2_101, %c0_102, %c0_103] : memref<4x8x4xbf16, #tpu.memory_space<vmem>>, vector<1x8x4xbf16>
    %186 = vector.shape_cast %185 : vector<1x8x4xbf16> to vector<8x4xbf16>
    %187 = arith.truncf %184 : vector<4x512xf32> to vector<4x512xbf16>
    %cst_104 = arith.constant dense<0.000000e+00> : vector<8x512xf32>
    %188 = tpu.matmul %186, %187, %cst_104 {dimension_numbers = #tpu.dot_dimension_numbers<[1], [0], [0], [1], [0, 0, 1, 1], [], []>} : vector<8x4xbf16>, vector<4x512xbf16>, vector<8x512xf32> -> vector<8x512xf32>
    %189 = arith.addf %183, %188 : vector<8x512xf32>
    %c509_i32_105 = arith.constant 509 : i32
    %190 = tpu.dynamic_rotate %3 by %c509_i32_105 dim 1 : vector<4x512xf32>, i32 -> vector<4x512xf32>
    %c3_106 = arith.constant 3 : index
    %c0_107 = arith.constant 0 : index
    %c0_108 = arith.constant 0 : index
    %191 = vector.load %arg4[%c3_106, %c0_107, %c0_108] : memref<4x8x4xbf16, #tpu.memory_space<vmem>>, vector<1x8x4xbf16>
    %192 = vector.shape_cast %191 : vector<1x8x4xbf16> to vector<8x4xbf16>
    %193 = arith.truncf %190 : vector<4x512xf32> to vector<4x512xbf16>
    %cst_109 = arith.constant dense<0.000000e+00> : vector<8x512xf32>
    %194 = tpu.matmul %192, %193, %cst_109 {dimension_numbers = #tpu.dot_dimension_numbers<[1], [0], [0], [1], [0, 0, 1, 1], [], []>} : vector<8x4xbf16>, vector<4x512xbf16>, vector<8x512xf32> -> vector<8x512xf32>
    %195 = arith.addf %189, %194 : vector<8x512xf32>
    %c22_i32 = arith.constant 22 : i32
    %196 = tpu.dynamic_rotate %171 by %c22_i32 dim 1 : vector<8x512xf32>, i32 -> vector<8x512xf32>
    %197 = tpu.iota {dimensions = array<i32: 1>} : vector<8x512xi32>
    %c22_i32_110 = arith.constant 22 : i32
    %198 = vector.broadcast %c22_i32_110 : i32 to vector<8x512xi32>
    %199 = arith.cmpi sge, %197, %198 : vector<8x512xi32>
    %cst_111 = arith.constant 0.000000e+00 : f32
    %200 = vector.broadcast %cst_111 : f32 to vector<8x512xf32>
    %201 = arith.select %199, %196, %200 : vector<8x512xi1>, vector<8x512xf32>
    %c0_112 = arith.constant 0 : index
    %c0_113 = arith.constant 0 : index
    %202 = vector.load %arg5[%c0_112, %c0_113] : memref<8x8xbf16, #tpu.memory_space<vmem>>, vector<8x8xbf16>
    %203 = arith.truncf %201 : vector<8x512xf32> to vector<8x512xbf16>
    %cst_114 = arith.constant dense<0.000000e+00> : vector<8x512xf32>
    %204 = tpu.matmul %202, %203, %cst_114 {dimension_numbers = #tpu.dot_dimension_numbers<[1], [0], [0], [1], [0, 0, 1, 1], [], []>} : vector<8x8xbf16>, vector<8x512xbf16>, vector<8x512xf32> -> vector<8x512xf32>
    %205 = arith.addf %195, %204 : vector<8x512xf32>
    %206 = vector.extract_strided_slice %171 {offsets = [0, 0], sizes = [4, 512], strides = [1, 1]} : vector<8x512xf32> to vector<4x512xf32>
    %207 = vector.extract_strided_slice %171 {offsets = [4, 0], sizes = [4, 512], strides = [1, 1]} : vector<8x512xf32> to vector<4x512xf32>
    %208 = math.tanh %206 : vector<4x512xf32>
    %cst_115 = arith.constant 5.000000e-01 : f32
    %209 = vector.broadcast %cst_115 : f32 to vector<4x512xf32>
    %210 = arith.mulf %209, %207 : vector<4x512xf32>
    %211 = math.tanh %210 : vector<4x512xf32>
    %cst_116 = arith.constant 5.000000e-01 : f32
    %212 = vector.broadcast %cst_116 : f32 to vector<4x512xf32>
    %213 = arith.mulf %212, %211 : vector<4x512xf32>
    %cst_117 = arith.constant 5.000000e-01 : f32
    %214 = vector.broadcast %cst_117 : f32 to vector<4x512xf32>
    %215 = arith.addf %213, %214 : vector<4x512xf32>
    %216 = arith.mulf %208, %215 : vector<4x512xf32>
    %217 = vector.extract_strided_slice %205 {offsets = [0, 0], sizes = [4, 512], strides = [1, 1]} : vector<8x512xf32> to vector<4x512xf32>
    %218 = vector.extract_strided_slice %205 {offsets = [4, 0], sizes = [4, 512], strides = [1, 1]} : vector<8x512xf32> to vector<4x512xf32>
    %219 = math.tanh %217 : vector<4x512xf32>
    %cst_118 = arith.constant 5.000000e-01 : f32
    %220 = vector.broadcast %cst_118 : f32 to vector<4x512xf32>
    %221 = arith.mulf %220, %218 : vector<4x512xf32>
    %222 = math.tanh %221 : vector<4x512xf32>
    %cst_119 = arith.constant 5.000000e-01 : f32
    %223 = vector.broadcast %cst_119 : f32 to vector<4x512xf32>
    %224 = arith.mulf %223, %222 : vector<4x512xf32>
    %cst_120 = arith.constant 5.000000e-01 : f32
    %225 = vector.broadcast %cst_120 : f32 to vector<4x512xf32>
    %226 = arith.addf %224, %225 : vector<4x512xf32>
    %227 = arith.mulf %219, %226 : vector<4x512xf32>
    %c0_121 = arith.constant 0 : index
    %c0_122 = arith.constant 0 : index
    %228 = vector.load %arg6[%c0_121, %c0_122] : memref<4x4xbf16, #tpu.memory_space<vmem>>, vector<4x4xbf16>
    %229 = arith.truncf %227 : vector<4x512xf32> to vector<4x512xbf16>
    %cst_123 = arith.constant dense<0.000000e+00> : vector<4x512xf32>
    %230 = tpu.matmul %228, %229, %cst_123 {dimension_numbers = #tpu.dot_dimension_numbers<[1], [0], [0], [1], [0, 0, 1, 1], [], []>} : vector<4x4xbf16>, vector<4x512xbf16>, vector<4x512xf32> -> vector<4x512xf32>
    %231 = arith.addf %190, %230 : vector<4x512xf32>
    %c0_124 = arith.constant 0 : index
    %c0_125 = arith.constant 0 : index
    %c0_126 = arith.constant 0 : index
    %232 = vector.load %arg7[%c0_124, %c0_125, %c0_126] : memref<1x8x512xf32, #tpu.memory_space<vmem>>, vector<1x4x512xf32>
    %233 = vector.shape_cast %232 : vector<1x4x512xf32> to vector<4x512xf32>
    %234 = vector.shape_cast %216 : vector<4x512xf32> to vector<1x4x512xf32>
    tpu.vector_store %arg7[%c0_124, %c0_125, %c0_126], %234 {strides = array<i32>} : memref<1x8x512xf32, #tpu.memory_space<vmem>>, vector<1x4x512xf32>,
    %c0_127 = arith.constant 0 : index
    %c4_128 = arith.constant 4 : index
    %c0_129 = arith.constant 0 : index
    %235 = vector.load %arg7[%c0_127, %c4_128, %c0_129] : memref<1x8x512xf32, #tpu.memory_space<vmem>>, vector<1x4x512xf32>
    %236 = vector.shape_cast %235 : vector<1x4x512xf32> to vector<4x512xf32>
    %237 = vector.shape_cast %231 : vector<4x512xf32> to vector<1x4x512xf32>
    tpu.vector_store %arg7[%c0_127, %c4_128, %c0_129], %237 {strides = array<i32>} : memref<1x8x512xf32, #tpu.memory_space<vmem>>, vector<1x4x512xf32>,
    return
  }
  func.func @transform_0(%arg0: i32) -> (i32, i32, i32) {
    %c0_i32 = arith.constant 0 : i32
    %c0_i32_0 = arith.constant 0 : i32
    %c0_i32_1 = arith.constant 0 : i32
    return %arg0, %c0_i32, %c0_i32_0 : i32, i32, i32
  }
  func.func @transform_1(%arg0: i32) -> (i32, i32, i32) {
    %c0_i32 = arith.constant 0 : i32
    %c0_i32_0 = arith.constant 0 : i32
    %c0_i32_1 = arith.constant 0 : i32
    return %arg0, %c0_i32, %c0_i32_0 : i32, i32, i32
  }
  func.func @transform_2(%arg0: i32) -> (i32, i32, i32) {
    %c0_i32 = arith.constant 0 : i32
    %c0_i32_0 = arith.constant 0 : i32
    %c0_i32_1 = arith.constant 0 : i32
    %c0_i32_2 = arith.constant 0 : i32
    return %c0_i32, %c0_i32_0, %c0_i32_1 : i32, i32, i32
  }
  func.func @transform_3(%arg0: i32) -> (i32, i32, i32) {
    %c0_i32 = arith.constant 0 : i32
    %c0_i32_0 = arith.constant 0 : i32
    %c0_i32_1 = arith.constant 0 : i32
    %c0_i32_2 = arith.constant 0 : i32
    return %c0_i32, %c0_i32_0, %c0_i32_1 : i32, i32, i32
  }
  func.func @transform_4(%arg0: i32) -> (i32, i32) {
    %c0_i32 = arith.constant 0 : i32
    %c0_i32_0 = arith.constant 0 : i32
    %c0_i32_1 = arith.constant 0 : i32
    return %c0_i32, %c0_i32_0 : i32, i32
  }
  func.func @transform_5(%arg0: i32) -> (i32, i32) {
    %c0_i32 = arith.constant 0 : i32
    %c0_i32_0 = arith.constant 0 : i32
    %c0_i32_1 = arith.constant 0 : i32
    return %c0_i32, %c0_i32_0 : i32, i32
  }
  func.func @transform_6(%arg0: i32) -> (i32, i32, i32) {
    %c0_i32 = arith.constant 0 : i32
    %c0_i32_0 = arith.constant 0 : i32
    %c0_i32_1 = arith.constant 0 : i32
    return %arg0, %c0_i32, %c0_i32_0 : i32, i32, i32
  }
}

</mosaic_0001>

<bundles_post_ra>
// kernel: tpu_custom_call.1
= control target key start
LH: loop header
LB: loop body
LE: loop exit
PB: predicated region body
PF: predicated region fallthrough
CT: control target
= control target key end

     0   :  { %11 = vsyncpa [#allocation3], 0  ;;  %s6372_s0 = inlined_call_operand.vmem [shape: f32[2,4,512], index: 0, kind: input, shape index: {}]   ;;  %s6373_s1 = inlined_call_operand.vmem [shape: f32[2,4,512], index: 1, kind: input, shape index: {}]   ;;  %s6374_s2 = inlined_call_operand.vmem [shape: bf16[28,8,4], index: 2, kind: input, shape index: {}]   ;;  %s6375_s3 = inlined_call_operand.vmem [shape: bf16[4,8,4], index: 3, kind: input, shape index: {}]   ;;  %s6376_s4 = inlined_call_operand.vmem [shape: bf16[8,8], index: 4, kind: input, shape index: {}]   ;;  %s6377_s5 = inlined_call_operand.vmem [shape: bf16[4,4], index: 5, kind: input, shape index: {}]   ;;  %s6378_s6 = inlined_call_operand.hbm [shape: f32[2,8,512], index: 6, kind: output, shape index: {}]  }
   0x1   :  { %13 = vsyncpa [#allocation3 + $0x1], 0  ;;  %s5464_s21 = smov 0   ;;  %s5466_s22 = smov 0  }
   0x2   :  { %s5468_s23 = smov 0   ;;  %s5470_s24 = smov 0  }
   0x3 LB: > { %s5485_s25 = sadd.s32 4294967295, %s5397_s24   ;;  %s4500_s26 = sadd.s32 4294967294, %s5397_s24   ;;  %s5397_s24 = sphi %s5470_s24, %s6384_s24   ;;  %s5393_s23 = sphi %s5468_s23, %s6383_s23   ;;  %s5389_s22 = sphi %s5466_s22, %s6382_s22   ;;  %s5385_s21 = sphi %s5464_s21, %s6381_s21  }
   0x4   : > { %s5489_s27 = sadd.s32 1, %s5397_s24   ;;  %s162_s28 = sadd.s32 1, %s5393_s23 }
   0x5   : > { %s159_s29 = ssub.s32 %s5397_s24, %s5489_s27  ;;  %p172_p0 = scmp.ne.s32.totalorder %s5393_s23, %s5389_s22 }
   0x6   : > { %p160_p1 = scmp.eq.s32.totalorder %s159_s29, 0  ;;  %p173_p2 = scmp.eq.s32.totalorder %s5485_s25, 1 }
   0x7   : > { %p178_p3 = scmp.ne.s32.totalorder %s5389_s22, %s5385_s21  ;;  %p179_p4 = scmp.eq.s32.totalorder %s4500_s26, 1 }
   0x8   : > { %s5500_s30 = scalar_select %p160_p1, %s5393_s23, %s162_s28  }
   0x9   : > { %p5502_p5 = por %p173_p2, %p172_p0  ;;  %p5506_p6 = por %p179_p4, %p178_p3 }
   0xa   : > { %p4503_p7 = scmp.ge.s32.totalorder %s5397_s24, 1  ;;  %p225_p8 = scmp.lt.s32.totalorder %s5397_s24, 3 }
   0xc   : > { %p226_p9 = pnand %p4503_p7, %p225_p8 }
   0xd   : > { %p260_p10 = scmp.lt.s32.totalorder (!%p226_p9), %s5485_s25, 1  ;;  %v5399_v5 = vmov (!%p226_p9), 0   ;;  %s5400_s14 = smov (!%p226_p9), 127   ;;  %v294_v7 = vlaneseq (!%p226_p9)  ;;  %vm311_vm0 = vcmask (!%p226_p9), 1041408   ;;  %v4509_v37 = vld [vmem:[%s6374_s2 + $0x4] sm:$0xf] (!%p226_p9) }
   0xe   : > { %229 = sbr.rel (%p226_p9) target bundleno = 1292 (0x50c), region = 44  ;;  %356 = vmatprep.mubr.bf16.mxu0 (!%p226_p9), %v5399_v5  ;;  %397 = vmatprep.mubr.bf16.mxu1 (!%p226_p9), %v5399_v5  ;;  %s5401_s15 = smov (!%p226_p9), 126   ;;  %vm307_vm3 = vcmask (!%p226_p9), 31744   ;;  %v285_v54 = vld [vmem:[%s6374_s2] sm:$0xf] (!%p226_p9) }
   0xf   : > { %s5402_s16 = smov (!%p226_p9), 125   ;;  %s5403_s17 = smov (!%p226_p9), 124   ;;  %v5590_v8 = vand.u32 (!%p226_p9), 127, %v294_v7 }
  0x10   : > { %s5404_s18 = smov (!%p226_p9), 123   ;;  %s5405_s19 = smov (!%p226_p9), 122  }
  0x11   : > { %s5406_s20 = smov (!%p226_p9), 106   ;;  %s5407_s26 = smov (!%p226_p9), 105   ;;  %vm296_vm1 = vcmp.lt.s32.totalorder (!%p226_p9), %v5590_v8, 127  ;;  %vm511_vm2 = vcmp.lt.s32.totalorder (!%p226_p9), %v5590_v8, 126  ;;  %vm631_vm4 = vcmp.lt.s32.totalorder (!%p226_p9), %v5590_v8, 125  ;;  %vm751_vm5 = vcmp.lt.s32.totalorder (!%p226_p9), %v5590_v8, 124 }
  0x12   : > { %s5408_s28 = smov (!%p226_p9), 104   ;;  %s5409_s29 = smov (!%p226_p9), 103   ;;  %vm871_vm6 = vcmp.lt.s32.totalorder (!%p226_p9), %v5590_v8, 123  ;;  %vm991_vm7 = vcmp.lt.s32.totalorder (!%p226_p9), %v5590_v8, 122  ;;  %vm1111_vm8 = vcmp.lt.s32.totalorder (!%p226_p9), %v5590_v8, 106  ;;  %vm1231_vm9 = vcmp.lt.s32.totalorder (!%p226_p9), %v5590_v8, 105 }
  0x13   : > { %s5410_s11 = smov (!%p226_p9), 102   ;;  %s5411_s12 = smov (!%p226_p9), 101   ;;  %vm1351_vm10 = vcmp.lt.s32.totalorder (!%p226_p9), %v5590_v8, 104  ;;  %vm1471_vm11 = vcmp.lt.s32.totalorder (!%p226_p9), %v5590_v8, 103  ;;  %vm1591_vm12 = vcmp.lt.s32.totalorder (!%p226_p9), %v5590_v8, 102  ;;  %vm1711_vm13 = vcmp.lt.s32.totalorder (!%p226_p9), %v5590_v8, 101 }
  0x14   : > { %vm1831_vm14 = vcmp.lt.s32.totalorder (!%p226_p9), %v5590_v8, 100  ;;  %vm1951_vm15 = vcmp.lt.s32.totalorder (!%p226_p9), %v5590_v8, 84 }
  0x15   : > { %s5514_s9 = scalar_select %p260_p10, %s5485_s25, 1 }
  0x17   : > { %s4680_s10 = sshll.u32 %s5514_s9, 4  ;;  %s5427_s9 = smov 22  }
  0x18   : > { %s264_s13 = scalar_lea.vmem %s6372_s0, %s4680_s10 }
  0x19   : > { %v5522_v0 = vld [vmem:[%s264_s13] sm:$0xff]  ;;  %v5524_v1 = vld [vmem:[%s264_s13 + $0x8] sm:$0xff]  ;;  %s5412_s13 = smov 100  }
  0x1a   : > { %v5528_v2 = vpack.i.bf16 %v5524_v1, %v5522_v0  ;;  %v5532_v3 = vcombine.high %v5522_v0, %v5522_v0  ;;  %v5536_v4 = vcombine.high %v5524_v1, %v5524_v1  ;;  %v281_v16 = vpack.c.bf16 %v5522_v0, %v5522_v0 }
  0x1b   : > { %v283_v17 = vpack.c.bf16 %v5524_v1, %v5524_v1 }
  0x1c   : > { %5000 = vrot.lane.b32.xlu0 %v5528_v2, %s5400_s14  ;;  %v5544_v6 = vpack.i.bf16 %v5532_v3, %v5536_v4  ;;  %5010 = vrot.lane.b32.xlu1 %v5528_v2, %s5401_s15  ;;  %v282_v11 = vpack.c.bf16 %v5532_v3, %v5532_v3  ;;  %v284_v12 = vpack.c.bf16 %v5536_v4, %v5536_v4  ;;  %v410_v38 = vsel %vm311_vm0, %v281_v16, 0 }
  0x1d   : > { %v416_v39 = vsel %vm311_vm0, %v283_v17, 0 }
  0x20   : > { %5005 = vrot.lane.b32.xlu0 %v5544_v6, %s5400_s14  ;;  %5015 = vrot.lane.b32.xlu1 %v5544_v6, %s5401_s15 }
  0x24   : > { %5025 = vrot.lane.b32.xlu1 %v5544_v6, %s5402_s16  ;;  %5020 = vrot.lane.b32.xlu0 %v5528_v2, %s5402_s16 }
  0x28   : > { %5035 = vrot.lane.b32.xlu1 %v5544_v6, %s5403_s17  ;;  %5030 = vrot.lane.b32.xlu0 %v5528_v2, %s5403_s17  ;;  %s5413_s17 = smov 84  }
  0x2c   : > { %5045 = vrot.lane.b32.xlu1 %v5544_v6, %s5404_s18  ;;  %5040 = vrot.lane.b32.xlu0 %v5528_v2, %s5404_s18  ;;  %s5414_s18 = smov 83  }
  0x30   : > { %5055 = vrot.lane.b32.xlu1 %v5544_v6, %s5405_s19  ;;  %5050 = vrot.lane.b32.xlu0 %v5528_v2, %s5405_s19  ;;  %s5415_s19 = smov 82  }
  0x34   : > { %5065 = vrot.lane.b32.xlu1 %v5544_v6, %s5406_s20  ;;  %5060 = vrot.lane.b32.xlu0 %v5528_v2, %s5406_s20  ;;  %s5416_s20 = smov 81  }
  0x38   : > { %5075 = vrot.lane.b32.xlu1 %v5544_v6, %s5407_s26  ;;  %5070 = vrot.lane.b32.xlu0 %v5528_v2, %s5407_s26  ;;  %s5417_s26 = smov 80  }
  0x3c   : > { %5085 = vrot.lane.b32.xlu1 %v5544_v6, %s5408_s28  ;;  %5080 = vrot.lane.b32.xlu0 %v5528_v2, %s5408_s28  ;;  %s5418_s28 = smov 79  }
  0x40   : > { %5095 = vrot.lane.b32.xlu1 %v5544_v6, %s5409_s29  ;;  %5090 = vrot.lane.b32.xlu0 %v5528_v2, %s5409_s29  ;;  %s5419_s29 = smov 78  }
  0x44   : > { %5105 = vrot.lane.b32.xlu1 %v5544_v6, %s5410_s11  ;;  %5100 = vrot.lane.b32.xlu0 %v5528_v2, %s5410_s11  ;;  %s5420_s11 = smov 62  }
  0x48   : > { %5115 = vrot.lane.b32.xlu1 %v5544_v6, %s5411_s12  ;;  %5110 = vrot.lane.b32.xlu0 %v5528_v2, %s5411_s12 }
  0x4c   : > { %5125 = vrot.lane.b32.xlu1 %v5544_v6, %s5412_s13  ;;  %5120 = vrot.lane.b32.xlu0 %v5528_v2, %s5412_s13 }
  0x50   : > { %5135 = vrot.lane.b32.xlu1 %v5544_v6, %s5413_s17  ;;  %5130 = vrot.lane.b32.xlu0 %v5528_v2, %s5413_s17  ;;  %s5421_s17 = smov 61  }
  0x54   : > { %5145 = vrot.lane.b32.xlu1 %v5544_v6, %s5414_s18  ;;  %5140 = vrot.lane.b32.xlu0 %v5528_v2, %s5414_s18  ;;  %s5424_s18 = smov 58  }
  0x58   : > { %5155 = vrot.lane.b32.xlu1 %v5544_v6, %s5415_s19  ;;  %5150 = vrot.lane.b32.xlu0 %v5528_v2, %s5415_s19  ;;  %s5425_s19 = smov 57  }
  0x5c   : > { %5165 = vrot.lane.b32.xlu1 %v5544_v6, %s5416_s20  ;;  %5160 = vrot.lane.b32.xlu0 %v5528_v2, %s5416_s20 }
  0x60   : > { %5175 = vrot.lane.b32.xlu1 %v5544_v6, %s5417_s26  ;;  %5170 = vrot.lane.b32.xlu0 %v5528_v2, %s5417_s26  ;;  %s4682_s26 = sshll.u32 %s5485_s25, 9 }
  0x61   : > { %s6326_s12 = scalar_lea.hbm %s6378_s6, %s4682_s26 }
  0x64   : > { %5185 = vrot.lane.b32.xlu1 %v5544_v6, %s5418_s28  ;;  %5180 = vrot.lane.b32.xlu0 %v5528_v2, %s5418_s28  ;;  %s5422_s28 = smov 60  }
  0x68   : > { %5195 = vrot.lane.b32.xlu1 %v5544_v6, %s5419_s29  ;;  %5190 = vrot.lane.b32.xlu0 %v5528_v2, %s5419_s29  ;;  %s5423_s29 = smov 59  }
  0x6c   : > { %5205 = vrot.lane.b32.xlu1 %v5544_v6, %s5420_s11  ;;  %5200 = vrot.lane.b32.xlu0 %v5528_v2, %s5420_s11 }
  0x70   : > { %5215 = vrot.lane.b32.xlu1 %v5544_v6, %s5421_s17  ;;  %5210 = vrot.lane.b32.xlu0 %v5528_v2, %s5421_s17  ;;  %s269_s17 = scalar_lea.vmem %s6373_s1, %s4680_s10  ;;  %s257_s10 = sand.u32 1, %s5389_s22  }
  0x71   : > { %s4415_s25 = scalar_lea.sflag [#allocation3], %s257_s10 }
  0x74   : > { %5225 = vrot.lane.b32.xlu1 %v5544_v6, %s5422_s28  ;;  %5220 = vrot.lane.b32.xlu0 %v5528_v2, %s5422_s28  ;;  %s5426_s28 = smov 56  }
  0x78   : > { %5235 = vrot.lane.b32.xlu1 %v5544_v6, %s5423_s29  ;;  %5230 = vrot.lane.b32.xlu0 %v5528_v2, %s5423_s29 }
  0x7c   : > { %5245 = vrot.lane.b32.xlu1 %v5544_v6, %s5424_s18  ;;  %5240 = vrot.lane.b32.xlu0 %v5528_v2, %s5424_s18 }
  0x80   : > { %5255 = vrot.lane.b32.xlu1 %v5544_v6, %s5425_s19  ;;  %5250 = vrot.lane.b32.xlu0 %v5528_v2, %s5425_s19 }
  0x84   : > { %5265 = vrot.lane.b32.xlu1 %v5544_v6, %s5426_s28  ;;  %5260 = vrot.lane.b32.xlu0 %v5528_v2, %s5426_s28 }
  0x8e   : > { %v5001_v9 = vpop.permute.xlu0 %5000  ;;  %v5011_v10 = vpop.permute.xlu1 %5010 }
  0x8f   : > { %v5003_v13 = vunpack.i.h.bf16 %v5001_v9  ;;  %v5002_v14 = vunpack.i.l.bf16 %v5001_v9  ;;  %v5013_v21 = vunpack.i.h.bf16 %v5011_v10  ;;  %v5012_v22 = vunpack.i.l.bf16 %v5011_v10 }
  0x92   : > { %v5006_v15 = vpop.permute.xlu0 %5005  ;;  %v5016_v18 = vpop.permute.xlu1 %5015 }
  0x93   : > { %v5008_v19 = vunpack.i.h.bf16 %v5006_v15  ;;  %v5007_v20 = vunpack.i.l.bf16 %v5006_v15  ;;  %v5018_v23 = vunpack.i.h.bf16 %v5016_v18  ;;  %v5017_v24 = vunpack.i.l.bf16 %v5016_v18 }
  0x95   : > { %v298_v25 = vsel %vm296_vm1, %v5008_v19, %v5003_v13  ;;  %v300_v26 = vsel %vm296_vm1, %v5007_v20, %v5002_v14  ;;  %v299_v27 = vsel %vm296_vm1, %v5002_v14, %v5008_v19  ;;  %v297_v28 = vsel %vm296_vm1, %v5003_v13, %v5007_v20 }
  0x96   : > { %v302_v29 = vpack.c.bf16 %v298_v25, %v298_v25  ;;  %v304_v30 = vpack.c.bf16 %v300_v26, %v300_v26  ;;  %v301_v31 = vpack.c.bf16 %v299_v27, %v299_v27  ;;  %v303_v32 = vpack.c.bf16 %v297_v28, %v297_v28  ;;  %v5026_v42 = vpop.permute.xlu1 %5025  ;;  %v5021_v43 = vpop.permute.xlu0 %5020  ;;  %v4523_v28 = vld [vmem:[%s6374_s2 + $0xc] sm:$0xf] }
  0x97   : > { %v513_v35 = vsel %vm511_vm2, %v5018_v23, %v5013_v21  ;;  %v515_v36 = vsel %vm511_vm2, %v5017_v24, %v5012_v22  ;;  %v514_v44 = vsel %vm511_vm2, %v5012_v22, %v5018_v23  ;;  %v512_v45 = vsel %vm511_vm2, %v5013_v21, %v5017_v24 }
  0x98   : > { %4510 = vmatprep.subr.msk.bf16.mxu0 %vm311_vm0, %v302_v29  ;;  %4512 = vmatprep.subr.msk.bf16.mxu1 %vm311_vm0, %v304_v30  ;;  %v313_v33 = vsel %vm311_vm0, %v301_v31, 0  ;;  %v319_v34 = vsel %vm311_vm0, %v303_v32, 0  ;;  %v517_v40 = vpack.c.bf16 %v513_v35, %v513_v35  ;;  %v519_v41 = vpack.c.bf16 %v515_v36, %v515_v36 }
  0x99   : > { %325 = vmatpush1.bf16.msra.mxu0 %v313_v33  ;;  %366 = vmatpush1.bf16.msra.mxu1 %v319_v34  ;;  %v5028_v46 = vunpack.i.h.bf16 %v5026_v42  ;;  %v5027_v47 = vunpack.i.l.bf16 %v5026_v42  ;;  %v5023_v48 = vunpack.i.h.bf16 %v5021_v43  ;;  %v5022_v49 = vunpack.i.l.bf16 %v5021_v43 }
  0x9a   : > { %4514 = vmatprep.subr.msk.bf16.mxu0 %vm311_vm0, %v282_v11  ;;  %4516 = vmatprep.subr.msk.bf16.mxu1 %vm311_vm0, %v284_v12  ;;  %v516_v50 = vpack.c.bf16 %v514_v44, %v514_v44  ;;  %v518_v51 = vpack.c.bf16 %v512_v45, %v512_v45  ;;  %v5036_v59 = vpop.permute.xlu1 %5035  ;;  %v5031_v60 = vpop.permute.xlu0 %5030  ;;  %v4518_v11 = vld [vmem:[%s6374_s2 + $0x8] sm:$0xf]  ;;  %v4528_v45 = vld [vmem:[%s6374_s2 + $0x10] sm:$0xf] }
  0x9b   : > { %v633_v52 = vsel %vm631_vm4, %v5028_v46, %v5023_v48  ;;  %v635_v53 = vsel %vm631_vm4, %v5027_v47, %v5022_v49  ;;  %v634_v61 = vsel %vm631_vm4, %v5022_v49, %v5028_v46  ;;  %v632_v62 = vsel %vm631_vm4, %v5023_v48, %v5027_v47 }
  0x9c   : > { %4511 = vmatmul.mubr.msk.bf16.vlgmr.msra.gmra.mrb[0].mxu0 %vm307_vm3, %v4509_v37  ;;  %4513 = vmatmul.mubr.msk.bf16.vlgmr.msra.gmra.mrb[0].mxu1 %vm307_vm3, %v4509_v37  ;;  %v526_v55 = vsel %vm311_vm0, %v516_v50, 0  ;;  %v532_v56 = vsel %vm311_vm0, %v518_v51, 0  ;;  %v637_v57 = vpack.c.bf16 %v633_v52, %v633_v52  ;;  %v639_v58 = vpack.c.bf16 %v635_v53, %v635_v53 }
  0x9d   : > { %422 = vmatpush1.bf16.msra.mxu0 %v410_v38  ;;  %463 = vmatpush1.bf16.msra.mxu1 %v416_v39  ;;  %v5038_v63 = vunpack.i.h.bf16 %v5036_v59  ;;  %v5037_v0 = vunpack.i.l.bf16 %v5036_v59  ;;  %v5033_v1 = vunpack.i.h.bf16 %v5031_v60  ;;  %v5032_v3 = vunpack.i.l.bf16 %v5031_v60 }
  0x9e   : > { %453 = vmatprep.mubr.bf16.mxu0 %v5399_v5  ;;  %494 = vmatprep.mubr.bf16.mxu1 %v5399_v5  ;;  %v636_v4 = vpack.c.bf16 %v634_v61, %v634_v61  ;;  %v638_v7 = vpack.c.bf16 %v632_v62, %v632_v62  ;;  %v5046_v16 = vpop.permute.xlu1 %5045  ;;  %v5041_v17 = vpop.permute.xlu0 %5040  ;;  %v4533_v62 = vld [vmem:[%s6374_s2 + $0x14] sm:$0xf] }
  0x9f   : > { %4519 = vmatprep.subr.msk.bf16.mxu0 %vm311_vm0, %v517_v40  ;;  %4521 = vmatprep.subr.msk.bf16.mxu1 %vm311_vm0, %v519_v41  ;;  %v753_v9 = vsel %vm751_vm5, %v5038_v63, %v5033_v1  ;;  %v755_v10 = vsel %vm751_vm5, %v5037_v0, %v5032_v3  ;;  %v754_v18 = vsel %vm751_vm5, %v5032_v3, %v5038_v63  ;;  %v5048_v20 = vunpack.i.h.bf16 %v5046_v16 }
  0xa0   : > { %v646_v12 = vsel %vm311_vm0, %v636_v4, 0  ;;  %v652_v13 = vsel %vm311_vm0, %v638_v7, 0  ;;  %v757_v14 = vpack.c.bf16 %v753_v9, %v753_v9  ;;  %v759_v15 = vpack.c.bf16 %v755_v10, %v755_v10 }
  0xa1   : > { %v752_v19 = vsel %vm751_vm5, %v5033_v1, %v5037_v0  ;;  %v5047_v21 = vunpack.i.l.bf16 %v5046_v16  ;;  %v5043_v22 = vunpack.i.h.bf16 %v5041_v17  ;;  %v5042_v23 = vunpack.i.l.bf16 %v5041_v17 }
  0xa2   : > { %v756_v24 = vpack.c.bf16 %v754_v18, %v754_v18  ;;  %v758_v25 = vpack.c.bf16 %v752_v19, %v752_v19  ;;  %v5056_v33 = vpop.permute.xlu1 %5055  ;;  %v5051_v34 = vpop.permute.xlu0 %5050  ;;  %v4538_v19 = vld [vmem:[%s6374_s2 + $0x18] sm:$0xf]  ;;  %vm2071_vm5 = vcmp.lt.s32.totalorder %v5590_v8, 83 }
  0xa3   : > { %v873_v26 = vsel %vm871_vm6, %v5048_v20, %v5043_v22  ;;  %v875_v27 = vsel %vm871_vm6, %v5047_v21, %v5042_v23  ;;  %v874_v35 = vsel %vm871_vm6, %v5042_v23, %v5048_v20  ;;  %v872_v36 = vsel %vm871_vm6, %v5043_v22, %v5047_v21 }
  0xa4   : > { %v766_v29 = vsel %vm311_vm0, %v756_v24, 0  ;;  %v772_v30 = vsel %vm311_vm0, %v758_v25, 0  ;;  %v877_v31 = vpack.c.bf16 %v873_v26, %v873_v26  ;;  %v879_v32 = vpack.c.bf16 %v875_v27, %v875_v27 }
  0xa5   : > { %v5058_v37 = vunpack.i.h.bf16 %v5056_v33  ;;  %v5057_v38 = vunpack.i.l.bf16 %v5056_v33  ;;  %v5053_v39 = vunpack.i.h.bf16 %v5051_v34  ;;  %v5052_v40 = vunpack.i.l.bf16 %v5051_v34  ;;  %v4543_v34 = vld [vmem:[%s6374_s2 + $0x1c] sm:$0xf] }
  0xa6   : > { %v876_v41 = vpack.c.bf16 %v874_v35, %v874_v35  ;;  %v878_v42 = vpack.c.bf16 %v872_v36, %v872_v36  ;;  %v5066_v50 = vpop.permute.xlu1 %5065  ;;  %v5061_v51 = vpop.permute.xlu0 %5060  ;;  %vm2191_vm6 = vcmp.lt.s32.totalorder %v5590_v8, 82 }
  0xa7   : > { %v993_v43 = vsel %vm991_vm7, %v5058_v37, %v5053_v39  ;;  %v995_v44 = vsel %vm991_vm7, %v5057_v38, %v5052_v40  ;;  %v994_v52 = vsel %vm991_vm7, %v5052_v40, %v5058_v37  ;;  %v992_v53 = vsel %vm991_vm7, %v5053_v39, %v5057_v38 }
  0xa8   : > { %4515 = vmatmul.mubr.msk.bf16.vlgmr.msra.gmra.mrb[0].mxu0 %vm307_vm3, %v285_v54  ;;  %4517 = vmatmul.mubr.msk.bf16.vlgmr.msra.gmra.mrb[0].mxu1 %vm307_vm3, %v285_v54  ;;  %v886_v46 = vsel %vm311_vm0, %v876_v41, 0  ;;  %v892_v47 = vsel %vm311_vm0, %v878_v42, 0  ;;  %v997_v48 = vpack.c.bf16 %v993_v43, %v993_v43  ;;  %v999_v49 = vpack.c.bf16 %v995_v44, %v995_v44 }
  0xa9   : > { %538 = vmatpush1.bf16.msra.mxu0 %v526_v55  ;;  %579 = vmatpush1.bf16.msra.mxu1 %v532_v56  ;;  %v5068_v54 = vunpack.i.h.bf16 %v5066_v50  ;;  %v5067_v55 = vunpack.i.l.bf16 %v5066_v50  ;;  %v5063_v56 = vunpack.i.h.bf16 %v5061_v51  ;;  %v998_v59 = vpack.c.bf16 %v992_v53, %v992_v53 }
  0xaa   : > { %569 = vmatprep.mubr.bf16.mxu0 %v5399_v5  ;;  %610 = vmatprep.mubr.bf16.mxu1 %v5399_v5  ;;  %v5076_v4 = vpop.permute.xlu1 %5075  ;;  %v5071_v7 = vpop.permute.xlu0 %5070  ;;  %vm2311_vm7 = vcmp.lt.s32.totalorder %v5590_v8, 81 }
  0xab   : > { %4524 = vmatprep.subr.msk.bf16.mxu0 %vm311_vm0, %v637_v57  ;;  %4526 = vmatprep.subr.msk.bf16.mxu1 %vm311_vm0, %v639_v58  ;;  %v5062_v57 = vunpack.i.l.bf16 %v5061_v51  ;;  %v996_v58 = vpack.c.bf16 %v994_v52, %v994_v52  ;;  %v1113_v60 = vsel %vm1111_vm8, %v5068_v54, %v5063_v56  ;;  %v1012_v0 = vsel %vm311_vm0, %v998_v59, 0  ;;  %v4548_v51 = vld [vmem:[%s6374_s2 + $0x20] sm:$0xf] }
  0xac   : > { %v1117_v1 = vpack.c.bf16 %v1113_v60, %v1113_v60  ;;  %v1112_v10 = vsel %vm1111_vm8, %v5063_v56, %v5067_v55 }
  0xad   : > { %v1115_v61 = vsel %vm1111_vm8, %v5067_v55, %v5062_v57  ;;  %v1006_v63 = vsel %vm311_vm0, %v996_v58, 0  ;;  %v1114_v9 = vsel %vm1111_vm8, %v5062_v57, %v5068_v54  ;;  %v1118_v16 = vpack.c.bf16 %v1112_v10, %v1112_v10 }
  0xae   : > { %v1119_v3 = vpack.c.bf16 %v1115_v61, %v1115_v61  ;;  %v5086_v2 = vpop.permute.xlu1 %5085  ;;  %v5081_v6 = vpop.permute.xlu0 %5080  ;;  %vm2431_vm8 = vcmp.lt.s32.totalorder %v5590_v8, 80 }
  0xaf   : > { %v1132_v21 = vsel %vm311_vm0, %v1118_v16, 0  ;;  %v5088_v26 = vunpack.i.h.bf16 %v5086_v2  ;;  %v5087_v27 = vunpack.i.l.bf16 %v5086_v2 }
  0xb2   : > { %v5096_v39 = vpop.permute.xlu1 %5095  ;;  %v5091_v40 = vpop.permute.xlu0 %5090 }
  0xb3   : > { %v5098_v43 = vunpack.i.h.bf16 %v5096_v39  ;;  %v5097_v44 = vunpack.i.l.bf16 %v5096_v39 }
  0xb4   : > { %4520 = vmatmul.mubr.msk.bf16.vlgmr.msra.gmra.mrb[0].mxu0 %vm307_vm3, %v4518_v11  ;;  %4522 = vmatmul.mubr.msk.bf16.vlgmr.msra.gmra.mrb[0].mxu1 %vm307_vm3, %v4518_v11  ;;  %v5078_v11 = vunpack.i.h.bf16 %v5076_v4 }
  0xb5   : > { %658 = vmatpush1.bf16.msra.mxu0 %v646_v12  ;;  %699 = vmatpush1.bf16.msra.mxu1 %v652_v13  ;;  %v5077_v12 = vunpack.i.l.bf16 %v5076_v4  ;;  %v5073_v13 = vunpack.i.h.bf16 %v5071_v7 }
  0xb6   : > { %689 = vmatprep.mubr.bf16.mxu0 %v5399_v5  ;;  %730 = vmatprep.mubr.bf16.mxu1 %v5399_v5  ;;  %v5106_v56 = vpop.permute.xlu1 %5105  ;;  %v5101_v57 = vpop.permute.xlu0 %5100 }
  0xb7   : > { %4529 = vmatprep.subr.msk.bf16.mxu0 %vm311_vm0, %v757_v14  ;;  %4531 = vmatprep.subr.msk.bf16.mxu1 %vm311_vm0, %v759_v15  ;;  %v5072_v14 = vunpack.i.l.bf16 %v5071_v7  ;;  %v1116_v15 = vpack.c.bf16 %v1114_v9, %v1114_v9  ;;  %v1233_v17 = vsel %vm1231_vm9, %v5078_v11, %v5073_v13  ;;  %v1232_v25 = vsel %vm1231_vm9, %v5073_v13, %v5077_v12  ;;  %v4553_v7 = vld [vmem:[%s6374_s2 + $0x24] sm:$0xf] }
  0xb8   : > { %v1237_v22 = vpack.c.bf16 %v1233_v17, %v1233_v17  ;;  %v5108_v60 = vunpack.i.h.bf16 %v5106_v56  ;;  %v5107_v61 = vunpack.i.l.bf16 %v5106_v56 }
  0xb9   : > { %v1235_v18 = vsel %vm1231_vm9, %v5077_v12, %v5072_v14  ;;  %v1126_v20 = vsel %vm311_vm0, %v1116_v15, 0  ;;  %v1234_v24 = vsel %vm1231_vm9, %v5072_v14, %v5078_v11  ;;  %vm2551_vm9 = vcmp.lt.s32.totalorder %v5590_v8, 79 }
  0xba   : > { %v1239_v23 = vpack.c.bf16 %v1235_v18, %v1235_v18  ;;  %v5116_v13 = vpop.permute.xlu1 %5115  ;;  %v5111_v14 = vpop.permute.xlu0 %5110 }
  0xbb   : > { %v5118_v17 = vunpack.i.h.bf16 %v5116_v13  ;;  %v5117_v18 = vunpack.i.l.bf16 %v5116_v13 }
  0xc0   : > { %4525 = vmatmul.mubr.msk.bf16.vlgmr.msra.gmra.mrb[0].mxu0 %vm307_vm3, %v4523_v28  ;;  %4527 = vmatmul.mubr.msk.bf16.vlgmr.msra.gmra.mrb[0].mxu1 %vm307_vm3, %v4523_v28  ;;  %v5083_v28 = vunpack.i.h.bf16 %v5081_v6 }
  0xc1   : > { %778 = vmatpush1.bf16.msra.mxu0 %v766_v29  ;;  %819 = vmatpush1.bf16.msra.mxu1 %v772_v30  ;;  %v5082_v29 = vunpack.i.l.bf16 %v5081_v6  ;;  %v1236_v30 = vpack.c.bf16 %v1234_v24, %v1234_v24  ;;  %v4558_v6 = vld [vmem:[%s6374_s2 + $0x28] sm:$0xf] }
  0xc2   : > { %809 = vmatprep.mubr.bf16.mxu0 %v5399_v5  ;;  %850 = vmatprep.mubr.bf16.mxu1 %v5399_v5  ;;  %v1352_v42 = vsel %vm1351_vm10, %v5083_v28, %v5087_v27 }
  0xc3   : > { %4534 = vmatprep.subr.msk.bf16.mxu0 %vm311_vm0, %v877_v31  ;;  %4536 = vmatprep.subr.msk.bf16.mxu1 %vm311_vm0, %v879_v32  ;;  %v1238_v31 = vpack.c.bf16 %v1232_v25, %v1232_v25  ;;  %v1353_v32 = vsel %vm1351_vm10, %v5088_v26, %v5083_v28  ;;  %v1355_v33 = vsel %vm1351_vm10, %v5087_v27, %v5082_v29  ;;  %v1246_v35 = vsel %vm311_vm0, %v1236_v30, 0  ;;  %v5126_v28 = vpop.permute.xlu1 %5125 }
  0xc4   : > { %v1357_v37 = vpack.c.bf16 %v1353_v32, %v1353_v32  ;;  %v1359_v38 = vpack.c.bf16 %v1355_v33, %v1355_v33  ;;  %v1354_v41 = vsel %vm1351_vm10, %v5082_v29, %v5088_v26  ;;  %v5121_v29 = vpop.permute.xlu0 %5120  ;;  %v5128_v32 = vunpack.i.h.bf16 %v5126_v28 }
  0xc5   : > { %v1252_v36 = vsel %vm311_vm0, %v1238_v31, 0  ;;  %v5127_v33 = vunpack.i.l.bf16 %v5126_v28  ;;  %vm2671_vm10 = vcmp.lt.s32.totalorder %v5590_v8, 78 }
  0xcc   : > { %4530 = vmatmul.mubr.msk.bf16.vlgmr.msra.gmra.mrb[0].mxu0 %vm307_vm3, %v4528_v45  ;;  %4532 = vmatmul.mubr.msk.bf16.vlgmr.msra.gmra.mrb[0].mxu1 %vm307_vm3, %v4528_v45  ;;  %v5093_v45 = vunpack.i.h.bf16 %v5091_v40 }
  0xcd   : > { %898 = vmatpush1.bf16.msra.mxu0 %v886_v46  ;;  %939 = vmatpush1.bf16.msra.mxu1 %v892_v47  ;;  %v5092_v46 = vunpack.i.l.bf16 %v5091_v40  ;;  %v1356_v47 = vpack.c.bf16 %v1354_v41, %v1354_v41  ;;  %v4563_v40 = vld [vmem:[%s6374_s2 + $0x2c] sm:$0xf] }
  0xce   : > { %929 = vmatprep.mubr.bf16.mxu0 %v5399_v5  ;;  %970 = vmatprep.mubr.bf16.mxu1 %v5399_v5  ;;  %v1472_v59 = vsel %vm1471_vm11, %v5093_v45, %v5097_v44 }
  0xcf   : > { %4539 = vmatprep.subr.msk.bf16.mxu0 %vm311_vm0, %v997_v48  ;;  %4541 = vmatprep.subr.msk.bf16.mxu1 %vm311_vm0, %v999_v49  ;;  %v1358_v48 = vpack.c.bf16 %v1352_v42, %v1352_v42  ;;  %v1473_v49 = vsel %vm1471_vm11, %v5098_v43, %v5093_v45  ;;  %v1475_v50 = vsel %vm1471_vm11, %v5097_v44, %v5092_v46  ;;  %v1366_v52 = vsel %vm311_vm0, %v1356_v47, 0  ;;  %v5136_v45 = vpop.permute.xlu1 %5135 }
  0xd0   : > { %v1477_v54 = vpack.c.bf16 %v1473_v49, %v1473_v49  ;;  %v1479_v55 = vpack.c.bf16 %v1475_v50, %v1475_v50  ;;  %v1474_v58 = vsel %vm1471_vm11, %v5092_v46, %v5098_v43  ;;  %v5131_v46 = vpop.permute.xlu0 %5130  ;;  %v5138_v49 = vunpack.i.h.bf16 %v5136_v45 }
  0xd1   : > { %v1372_v53 = vsel %vm311_vm0, %v1358_v48, 0  ;;  %v5137_v50 = vunpack.i.l.bf16 %v5136_v45  ;;  %vm2791_vm11 = vcmp.lt.s32.totalorder %v5590_v8, 62 }
  0xd8   : > { %4535 = vmatmul.mubr.msk.bf16.vlgmr.msra.gmra.mrb[0].mxu0 %vm307_vm3, %v4533_v62  ;;  %4537 = vmatmul.mubr.msk.bf16.vlgmr.msra.gmra.mrb[0].mxu1 %vm307_vm3, %v4533_v62  ;;  %v5103_v62 = vunpack.i.h.bf16 %v5101_v57 }
  0xd9   : > { %1018 = vmatpush1.bf16.msra.mxu0 %v1006_v63  ;;  %1059 = vmatpush1.bf16.msra.mxu1 %v1012_v0  ;;  %v5102_v63 = vunpack.i.l.bf16 %v5101_v57  ;;  %v1476_v0 = vpack.c.bf16 %v1474_v58, %v1474_v58  ;;  %v4568_v57 = vld [vmem:[%s6374_s2 + $0x30] sm:$0xf] }
  0xda   : > { %1049 = vmatprep.mubr.bf16.mxu0 %v5399_v5  ;;  %1090 = vmatprep.mubr.bf16.mxu1 %v5399_v5  ;;  %v1592_v16 = vsel %vm1591_vm12, %v5103_v62, %v5107_v61 }
  0xdb   : > { %4544 = vmatprep.subr.msk.bf16.mxu0 %vm311_vm0, %v1117_v1  ;;  %4546 = vmatprep.subr.msk.bf16.mxu1 %vm311_vm0, %v1119_v3  ;;  %v1478_v1 = vpack.c.bf16 %v1472_v59, %v1472_v59  ;;  %v1593_v3 = vsel %vm1591_vm12, %v5108_v60, %v5103_v62  ;;  %v1595_v4 = vsel %vm1591_vm12, %v5107_v61, %v5102_v63  ;;  %v1486_v9 = vsel %vm311_vm0, %v1476_v0, 0  ;;  %v5146_v62 = vpop.permute.xlu1 %5145 }
  0xdc   : > { %v1597_v11 = vpack.c.bf16 %v1593_v3, %v1593_v3  ;;  %v1599_v12 = vpack.c.bf16 %v1595_v4, %v1595_v4  ;;  %v1594_v15 = vsel %vm1591_vm12, %v5102_v63, %v5108_v60  ;;  %v5141_v63 = vpop.permute.xlu0 %5140  ;;  %v5148_v3 = vunpack.i.h.bf16 %v5146_v62 }
  0xdd   : > { %v1492_v10 = vsel %vm311_vm0, %v1478_v1, 0  ;;  %v5147_v4 = vunpack.i.l.bf16 %v5146_v62  ;;  %vm2911_vm12 = vcmp.lt.s32.totalorder %v5590_v8, 61 }
  0xe4   : > { %4540 = vmatmul.mubr.msk.bf16.vlgmr.msra.gmra.mrb[0].mxu0 %vm307_vm3, %v4538_v19  ;;  %4542 = vmatmul.mubr.msk.bf16.vlgmr.msra.gmra.mrb[0].mxu1 %vm307_vm3, %v4538_v19  ;;  %v5113_v19 = vunpack.i.h.bf16 %v5111_v14 }
  0xe5   : > { %1138 = vmatpush1.bf16.msra.mxu0 %v1126_v20  ;;  %1179 = vmatpush1.bf16.msra.mxu1 %v1132_v21  ;;  %v5112_v20 = vunpack.i.l.bf16 %v5111_v14  ;;  %v1596_v21 = vpack.c.bf16 %v1594_v15, %v1594_v15  ;;  %v4573_v14 = vld [vmem:[%s6374_s2 + $0x34] sm:$0xf] }
  0xe6   : > { %1169 = vmatprep.mubr.bf16.mxu0 %v5399_v5  ;;  %1210 = vmatprep.mubr.bf16.mxu1 %v5399_v5  ;;  %v1712_v31 = vsel %vm1711_vm13, %v5113_v19, %v5117_v18 }
  0xe7   : > { %4549 = vmatprep.subr.msk.bf16.mxu0 %vm311_vm0, %v1237_v22  ;;  %4551 = vmatprep.subr.msk.bf16.mxu1 %vm311_vm0, %v1239_v23  ;;  %v1598_v22 = vpack.c.bf16 %v1592_v16, %v1592_v16  ;;  %v1713_v23 = vsel %vm1711_vm13, %v5118_v17, %v5113_v19  ;;  %v1715_v2 = vsel %vm1711_vm13, %v5117_v18, %v5112_v20  ;;  %v1606_v24 = vsel %vm311_vm0, %v1596_v21, 0  ;;  %v5156_v19 = vpop.permute.xlu1 %5155 }
  0xe8   : > { %v1717_v26 = vpack.c.bf16 %v1713_v23, %v1713_v23  ;;  %v1719_v27 = vpack.c.bf16 %v1715_v2, %v1715_v2  ;;  %v1714_v30 = vsel %vm1711_vm13, %v5112_v20, %v5118_v17  ;;  %v5151_v20 = vpop.permute.xlu0 %5150  ;;  %v5158_v23 = vunpack.i.h.bf16 %v5156_v19 }
  0xe9   : > { %v1612_v25 = vsel %vm311_vm0, %v1598_v22, 0  ;;  %v5157_v2 = vunpack.i.l.bf16 %v5156_v19  ;;  %vm3031_vm13 = vcmp.lt.s32.totalorder %v5590_v8, 60 }
  0xf0   : > { %4545 = vmatmul.mubr.msk.bf16.vlgmr.msra.gmra.mrb[0].mxu0 %vm307_vm3, %v4543_v34  ;;  %4547 = vmatmul.mubr.msk.bf16.vlgmr.msra.gmra.mrb[0].mxu1 %vm307_vm3, %v4543_v34  ;;  %v5123_v34 = vunpack.i.h.bf16 %v5121_v29 }
  0xf1   : > { %1258 = vmatpush1.bf16.msra.mxu0 %v1246_v35  ;;  %1299 = vmatpush1.bf16.msra.mxu1 %v1252_v36  ;;  %v5122_v35 = vunpack.i.l.bf16 %v5121_v29  ;;  %v1716_v36 = vpack.c.bf16 %v1714_v30, %v1714_v30  ;;  %v4578_v29 = vld [vmem:[%s6374_s2 + $0x38] sm:$0xf] }
  0xf2   : > { %1289 = vmatprep.mubr.bf16.mxu0 %v5399_v5  ;;  %1330 = vmatprep.mubr.bf16.mxu1 %v5399_v5  ;;  %v1832_v48 = vsel %vm1831_vm14, %v5123_v34, %v5127_v33 }
  0xf3   : > { %4554 = vmatprep.subr.msk.bf16.mxu0 %vm311_vm0, %v1357_v37  ;;  %4556 = vmatprep.subr.msk.bf16.mxu1 %vm311_vm0, %v1359_v38  ;;  %v1718_v37 = vpack.c.bf16 %v1712_v31, %v1712_v31  ;;  %v1833_v38 = vsel %vm1831_vm14, %v5128_v32, %v5123_v34  ;;  %v1835_v39 = vsel %vm1831_vm14, %v5127_v33, %v5122_v35  ;;  %v1726_v41 = vsel %vm311_vm0, %v1716_v36, 0  ;;  %v5166_v34 = vpop.permute.xlu1 %5165 }
  0xf4   : > { %v1837_v43 = vpack.c.bf16 %v1833_v38, %v1833_v38  ;;  %v1839_v44 = vpack.c.bf16 %v1835_v39, %v1835_v39  ;;  %v1834_v47 = vsel %vm1831_vm14, %v5122_v35, %v5128_v32  ;;  %v5161_v35 = vpop.permute.xlu0 %5160  ;;  %v5168_v38 = vunpack.i.h.bf16 %v5166_v34 }
  0xf5   : > { %v1732_v42 = vsel %vm311_vm0, %v1718_v37, 0  ;;  %v5167_v39 = vunpack.i.l.bf16 %v5166_v34  ;;  %vm3151_vm14 = vcmp.lt.s32.totalorder %v5590_v8, 59 }
  0xfc   : > { %4550 = vmatmul.mubr.msk.bf16.vlgmr.msra.gmra.mrb[0].mxu0 %vm307_vm3, %v4548_v51  ;;  %4552 = vmatmul.mubr.msk.bf16.vlgmr.msra.gmra.mrb[0].mxu1 %vm307_vm3, %v4548_v51  ;;  %v5133_v51 = vunpack.i.h.bf16 %v5131_v46 }
  0xfd   : > { %1378 = vmatpush1.bf16.msra.mxu0 %v1366_v52  ;;  %1419 = vmatpush1.bf16.msra.mxu1 %v1372_v53  ;;  %v5132_v52 = vunpack.i.l.bf16 %v5131_v46  ;;  %v1836_v53 = vpack.c.bf16 %v1834_v47, %v1834_v47  ;;  %v4583_v46 = vld [vmem:[%s6374_s2 + $0x3c] sm:$0xf] }
  0xfe   : > { %1409 = vmatprep.mubr.bf16.mxu0 %v5399_v5  ;;  %1450 = vmatprep.mubr.bf16.mxu1 %v5399_v5  ;;  %v1952_v1 = vsel %vm1951_vm15, %v5133_v51, %v5137_v50 }
  0xff   : > { %4559 = vmatprep.subr.msk.bf16.mxu0 %vm311_vm0, %v1477_v54  ;;  %4561 = vmatprep.subr.msk.bf16.mxu1 %vm311_vm0, %v1479_v55  ;;  %v1838_v54 = vpack.c.bf16 %v1832_v48, %v1832_v48  ;;  %v1953_v55 = vsel %vm1951_vm15, %v5138_v49, %v5133_v51  ;;  %v1955_v56 = vsel %vm1951_vm15, %v5137_v50, %v5132_v52  ;;  %v1846_v58 = vsel %vm311_vm0, %v1836_v53, 0  ;;  %v5176_v51 = vpop.permute.xlu1 %5175 }
 0x100   : > { %v1957_v60 = vpack.c.bf16 %v1953_v55, %v1953_v55  ;;  %v1959_v61 = vpack.c.bf16 %v1955_v56, %v1955_v56  ;;  %v1954_v0 = vsel %vm1951_vm15, %v5132_v52, %v5138_v49  ;;  %v5171_v52 = vpop.permute.xlu0 %5170  ;;  %v5178_v55 = vunpack.i.h.bf16 %v5176_v51 }
 0x101   : > { %v1852_v59 = vsel %vm311_vm0, %v1838_v54, 0  ;;  %v5177_v56 = vunpack.i.l.bf16 %v5176_v51  ;;  %vm3271_vm15 = vcmp.lt.s32.totalorder %v5590_v8, 58 }
 0x108   : > { %4555 = vmatmul.mubr.msk.bf16.vlgmr.msra.gmra.mrb[0].mxu0 %vm307_vm3, %v4553_v7  ;;  %4557 = vmatmul.mubr.msk.bf16.vlgmr.msra.gmra.mrb[0].mxu1 %vm307_vm3, %v4553_v7  ;;  %v5143_v7 = vunpack.i.h.bf16 %v5141_v63 }
 0x109   : > { %1498 = vmatpush1.bf16.msra.mxu0 %v1486_v9  ;;  %1539 = vmatpush1.bf16.msra.mxu1 %v1492_v10  ;;  %v5142_v9 = vunpack.i.l.bf16 %v5141_v63  ;;  %v1956_v10 = vpack.c.bf16 %v1954_v0, %v1954_v0  ;;  %v4588_v63 = vld [vmem:[%s6374_s2 + $0x40] sm:$0xf] }
 0x10a   : > { %1529 = vmatprep.mubr.bf16.mxu0 %v5399_v5  ;;  %1570 = vmatprep.mubr.bf16.mxu1 %v5399_v5  ;;  %v2072_v22 = vsel %vm2071_vm5, %v5143_v7, %v5147_v4 }
 0x10b   : > { %4564 = vmatprep.subr.msk.bf16.mxu0 %vm311_vm0, %v1597_v11  ;;  %4566 = vmatprep.subr.msk.bf16.mxu1 %vm311_vm0, %v1599_v12  ;;  %v1958_v11 = vpack.c.bf16 %v1952_v1, %v1952_v1  ;;  %v2073_v12 = vsel %vm2071_vm5, %v5148_v3, %v5143_v7  ;;  %v2075_v13 = vsel %vm2071_vm5, %v5147_v4, %v5142_v9  ;;  %v1966_v15 = vsel %vm311_vm0, %v1956_v10, 0  ;;  %v5186_v7 = vpop.permute.xlu1 %5185 }
 0x10c   : > { %v2077_v17 = vpack.c.bf16 %v2073_v12, %v2073_v12  ;;  %v2079_v18 = vpack.c.bf16 %v2075_v13, %v2075_v13  ;;  %v2074_v21 = vsel %vm2071_vm5, %v5142_v9, %v5148_v3  ;;  %v5181_v9 = vpop.permute.xlu0 %5180  ;;  %v5188_v12 = vunpack.i.h.bf16 %v5186_v7 }
 0x10d   : > { %v1972_v16 = vsel %vm311_vm0, %v1958_v11, 0  ;;  %v5187_v13 = vunpack.i.l.bf16 %v5186_v7  ;;  %vm3391_vm5 = vcmp.lt.s32.totalorder %v5590_v8, 57 }
 0x114   : > { %4560 = vmatmul.mubr.msk.bf16.vlgmr.msra.gmra.mrb[0].mxu0 %vm307_vm3, %v4558_v6  ;;  %4562 = vmatmul.mubr.msk.bf16.vlgmr.msra.gmra.mrb[0].mxu1 %vm307_vm3, %v4558_v6  ;;  %v5153_v6 = vunpack.i.h.bf16 %v5151_v20 }
 0x115   : > { %1618 = vmatpush1.bf16.msra.mxu0 %v1606_v24  ;;  %1659 = vmatpush1.bf16.msra.mxu1 %v1612_v25  ;;  %v5152_v24 = vunpack.i.l.bf16 %v5151_v20  ;;  %v2076_v25 = vpack.c.bf16 %v2074_v21, %v2074_v21 }
 0x116   : > { %1649 = vmatprep.mubr.bf16.mxu0 %v5399_v5  ;;  %1690 = vmatprep.mubr.bf16.mxu1 %v5399_v5  ;;  %v2192_v37 = vsel %vm2191_vm6, %v5153_v6, %v5157_v2 }
 0x117   : > { %4569 = vmatprep.subr.msk.bf16.mxu0 %vm311_vm0, %v1717_v26  ;;  %4571 = vmatprep.subr.msk.bf16.mxu1 %vm311_vm0, %v1719_v27  ;;  %v2078_v26 = vpack.c.bf16 %v2072_v22, %v2072_v22  ;;  %v2193_v27 = vsel %vm2191_vm6, %v5158_v23, %v5153_v6  ;;  %v2195_v28 = vsel %vm2191_vm6, %v5157_v2, %v5152_v24  ;;  %v2086_v30 = vsel %vm311_vm0, %v2076_v25, 0 }
 0x118   : > { %v2197_v32 = vpack.c.bf16 %v2193_v27, %v2193_v27  ;;  %v2199_v33 = vpack.c.bf16 %v2195_v28, %v2195_v28  ;;  %v2194_v36 = vsel %vm2191_vm6, %v5152_v24, %v5158_v23  ;;  %v4593_v24 = vld [vmem:[%s6374_s2 + $0x44] sm:$0xf]  ;;  %vm3511_vm6 = vcmp.lt.s32.totalorder %v5590_v8, 56 }
 0x119   : > { %v2092_v31 = vsel %vm311_vm0, %v2078_v26, 0 }
 0x120   : > { %4565 = vmatmul.mubr.msk.bf16.vlgmr.msra.gmra.mrb[0].mxu0 %vm307_vm3, %v4563_v40  ;;  %4567 = vmatmul.mubr.msk.bf16.vlgmr.msra.gmra.mrb[0].mxu1 %vm307_vm3, %v4563_v40  ;;  %v5163_v40 = vunpack.i.h.bf16 %v5161_v35 }
 0x121   : > { %1738 = vmatpush1.bf16.msra.mxu0 %v1726_v41  ;;  %1779 = vmatpush1.bf16.msra.mxu1 %v1732_v42  ;;  %v5162_v41 = vunpack.i.l.bf16 %v5161_v35  ;;  %v2196_v42 = vpack.c.bf16 %v2194_v36, %v2194_v36 }
 0x122   : > { %1769 = vmatprep.mubr.bf16.mxu0 %v5399_v5  ;;  %1810 = vmatprep.mubr.bf16.mxu1 %v5399_v5  ;;  %v2312_v54 = vsel %vm2311_vm7, %v5163_v40, %v5167_v39 }
 0x123   : > { %4574 = vmatprep.subr.msk.bf16.mxu0 %vm311_vm0, %v1837_v43  ;;  %4576 = vmatprep.subr.msk.bf16.mxu1 %vm311_vm0, %v1839_v44  ;;  %v2198_v43 = vpack.c.bf16 %v2192_v37, %v2192_v37  ;;  %v2313_v44 = vsel %vm2311_vm7, %v5168_v38, %v5163_v40  ;;  %v2315_v45 = vsel %vm2311_vm7, %v5167_v39, %v5162_v41  ;;  %v2206_v47 = vsel %vm311_vm0, %v2196_v42, 0 }
 0x124   : > { %v2317_v49 = vpack.c.bf16 %v2313_v44, %v2313_v44  ;;  %v2319_v50 = vpack.c.bf16 %v2315_v45, %v2315_v45  ;;  %v2314_v53 = vsel %vm2311_vm7, %v5162_v41, %v5168_v38  ;;  %v4598_v41 = vld [vmem:[%s6374_s2 + $0x48] sm:$0xf]  ;;  %vm4113_vm7 = vcmask 64512  }
 0x125   : > { %v2212_v48 = vsel %vm311_vm0, %v2198_v43, 0 }
 0x12c   : > { %4570 = vmatmul.mubr.msk.bf16.vlgmr.msra.gmra.mrb[0].mxu0 %vm307_vm3, %v4568_v57  ;;  %4572 = vmatmul.mubr.msk.bf16.vlgmr.msra.gmra.mrb[0].mxu1 %vm307_vm3, %v4568_v57  ;;  %v5173_v57 = vunpack.i.h.bf16 %v5171_v52 }
 0x12d   : > { %1858 = vmatpush1.bf16.msra.mxu0 %v1846_v58  ;;  %1899 = vmatpush1.bf16.msra.mxu1 %v1852_v59  ;;  %v5172_v58 = vunpack.i.l.bf16 %v5171_v52  ;;  %v2316_v59 = vpack.c.bf16 %v2314_v53, %v2314_v53 }
 0x12e   : > { %1889 = vmatprep.mubr.bf16.mxu0 %v5399_v5  ;;  %1930 = vmatprep.mubr.bf16.mxu1 %v5399_v5  ;;  %v2432_v11 = vsel %vm2431_vm8, %v5173_v57, %v5177_v56 }
 0x12f   : > { %4579 = vmatprep.subr.msk.bf16.mxu0 %vm311_vm0, %v1957_v60  ;;  %4581 = vmatprep.subr.msk.bf16.mxu1 %vm311_vm0, %v1959_v61  ;;  %v2318_v60 = vpack.c.bf16 %v2312_v54, %v2312_v54  ;;  %v2433_v61 = vsel %vm2431_vm8, %v5178_v55, %v5173_v57  ;;  %v2435_v62 = vsel %vm2431_vm8, %v5177_v56, %v5172_v58  ;;  %v2326_v0 = vsel %vm311_vm0, %v2316_v59, 0 }
 0x130   : > { %v2437_v3 = vpack.c.bf16 %v2433_v61, %v2433_v61  ;;  %v2439_v4 = vpack.c.bf16 %v2435_v62, %v2435_v62  ;;  %v2434_v10 = vsel %vm2431_vm8, %v5172_v58, %v5178_v55  ;;  %v2438_v19 = vpack.c.bf16 %v2432_v11, %v2432_v11  ;;  %v4603_v58 = vld [vmem:[%s6374_s2 + $0x4c] sm:$0xf] }
 0x131   : > { %v2332_v1 = vsel %vm311_vm0, %v2318_v60, 0 }
 0x132   : > { %v2452_v26 = vsel %vm311_vm0, %v2438_v19, 0 }
 0x138   : > { %4575 = vmatmul.mubr.msk.bf16.vlgmr.msra.gmra.mrb[0].mxu0 %vm307_vm3, %v4573_v14  ;;  %4577 = vmatmul.mubr.msk.bf16.vlgmr.msra.gmra.mrb[0].mxu1 %vm307_vm3, %v4573_v14  ;;  %v5183_v14 = vunpack.i.h.bf16 %v5181_v9 }
 0x139   : > { %1978 = vmatpush1.bf16.msra.mxu0 %v1966_v15  ;;  %2019 = vmatpush1.bf16.msra.mxu1 %v1972_v16  ;;  %v5182_v15 = vunpack.i.l.bf16 %v5181_v9  ;;  %v5975_v16 = vld [vmem:[%s269_s17 + $0x8] sm:$0xff] }
 0x13a   : > { %2009 = vmatprep.mubr.bf16.mxu0 %v5399_v5  ;;  %2050 = vmatprep.mubr.bf16.mxu1 %v5399_v5  ;;  %v5981_v20 = vcombine.high %v5975_v16, %v5975_v16  ;;  %v2553_v22 = vsel %vm2551_vm9, %v5188_v12, %v5183_v14 }
 0x13b   : > { %4584 = vmatprep.subr.msk.bf16.mxu0 %vm311_vm0, %v2077_v17  ;;  %4586 = vmatprep.subr.msk.bf16.mxu1 %vm311_vm0, %v2079_v18  ;;  %v5977_v17 = vld [vmem:[%s269_s17] sm:$0xff]  ;;  %v2436_v18 = vpack.c.bf16 %v2434_v10, %v2434_v10  ;;  %v2555_v23 = vsel %vm2551_vm9, %v5187_v13, %v5182_v15  ;;  %v2557_v27 = vpack.c.bf16 %v2553_v22, %v2553_v22  ;;  %s5428_s17 = smov [#allocation2]  }
 0x13c   : > { %v5985_v21 = vcombine.high %v5977_v17, %v5977_v17  ;;  %v5274_v2 = vpack.i.bf16 %v5981_v20, %v5975_v16  ;;  %v2559_v28 = vpack.c.bf16 %v2555_v23, %v2555_v23 }
 0x13d   : > { %v2446_v25 = vsel %vm311_vm0, %v2436_v18, 0 }
 0x13e   : > { %v5269_v6 = vpack.i.bf16 %v5985_v21, %v5977_v17  ;;  %5275 = vrot.lane.b32.xlu1 %v5274_v2, %s5400_s14 }
 0x140   : > { %5270 = vrot.lane.b32.xlu0 %v5269_v6, %s5400_s14  ;;  %s4504_s14 = sshll.u32 %s257_s10, 5 }
 0x141   : > { %s6293_s18 = scalar_lea.vmem [#allocation2], %s4504_s14 }
 0x142   : > { %5285 = vrot.lane.b32.xlu1 %v5274_v2, %s5401_s15  ;;  %s4429_s28 = sshll.u32 %s6293_s18, 4  ;;  %s6328_s28 = int_to_ptr.vmem [resolvable:$true] %s4429_s28 }
 0x143   : > { %s5335_s13 = scalar_lea.vmem %s6328_s28, 512 }
 0x144   : > { %4580 = vmatmul.mubr.msk.bf16.vlgmr.msra.gmra.mrb[0].mxu0 %vm307_vm3, %v4578_v29  ;;  %4582 = vmatmul.mubr.msk.bf16.vlgmr.msra.gmra.mrb[0].mxu1 %vm307_vm3, %v4578_v29  ;;  %v5196_v29 = vpop.permute.xlu1 %5195  ;;  %p5336_p11 = scmp.ne.s32.totalorder %s6328_s28, %s5335_s13 }
 0x145   : > { %2098 = vmatpush1.bf16.msra.mxu0 %v2086_v30  ;;  %2139 = vmatpush1.bf16.msra.mxu1 %v2092_v31  ;;  %v5191_v30 = vpop.permute.xlu0 %5190  ;;  %v2554_v31 = vsel %vm2551_vm9, %v5182_v15, %v5188_v12  ;;  %v5197_v34 = vunpack.i.l.bf16 %v5196_v29  ;;  %v4608_v15 = vld [vmem:[%s6374_s2 + $0x50] sm:$0xf] }
 0x146   : > { %2129 = vmatprep.mubr.bf16.mxu0 %v5399_v5  ;;  %2170 = vmatprep.mubr.bf16.mxu1 %v5399_v5  ;;  %v5193_v35 = vunpack.i.h.bf16 %v5191_v30  ;;  %v5192_v36 = vunpack.i.l.bf16 %v5191_v30  ;;  %v2556_v37 = vpack.c.bf16 %v2554_v31, %v2554_v31  ;;  %p5337_p12 = pnand %p5336_p11, %p5502_p5 }
 0x147   : > { %4589 = vmatprep.subr.msk.bf16.mxu0 %vm311_vm0, %v2197_v32  ;;  %4591 = vmatprep.subr.msk.bf16.mxu1 %vm311_vm0, %v2199_v33  ;;  %v2552_v32 = vsel %vm2551_vm9, %v5183_v14, %v5187_v13  ;;  %v5198_v33 = vunpack.i.h.bf16 %v5196_v29 }
 0x148   : > { %5280 = vrot.lane.b32.xlu0 %v5269_v6, %s5401_s15  ;;  %v2558_v38 = vpack.c.bf16 %v2552_v32, %v2552_v32  ;;  %v2675_v40 = vsel %vm2671_vm10, %v5197_v34, %v5192_v36  ;;  %3967 = vrot.lane.b32.xlu1 %v5985_v21, %s5402_s16  ;;  %v2566_v42 = vsel %vm311_vm0, %v2556_v37, 0  ;;  %p5338_p13 = pneg %p5337_p12 }
 0x149   : > { %v2673_v39 = vsel %vm2671_vm10, %v5198_v33, %v5193_v35  ;;  %v2679_v45 = vpack.c.bf16 %v2675_v40, %v2675_v40 }
 0x14a   : > { %v2572_v43 = vsel %vm311_vm0, %v2558_v38, 0  ;;  %v2677_v44 = vpack.c.bf16 %v2673_v39, %v2673_v39 }
 0x14c   : > { %3965 = vrot.lane.b32.xlu0 %v5977_v17, %s5402_s16  ;;  %3971 = vrot.lane.b32.xlu1 %v5981_v20, %s5402_s16 }
 0x150   : > { %4585 = vmatmul.mubr.msk.bf16.vlgmr.msra.gmra.mrb[0].mxu0 %vm307_vm3, %v4583_v46  ;;  %4587 = vmatmul.mubr.msk.bf16.vlgmr.msra.gmra.mrb[0].mxu1 %vm307_vm3, %v4583_v46  ;;  %v5206_v46 = vpop.permute.xlu1 %5205 }
 0x151   : > { %2218 = vmatpush1.bf16.msra.mxu0 %v2206_v47  ;;  %2259 = vmatpush1.bf16.msra.mxu1 %v2212_v48  ;;  %v5201_v47 = vpop.permute.xlu0 %5200  ;;  %v2674_v48 = vsel %vm2671_vm10, %v5192_v36, %v5198_v33  ;;  %v5207_v51 = vunpack.i.l.bf16 %v5206_v46 }
 0x152   : > { %2249 = vmatprep.mubr.bf16.mxu0 %v5399_v5  ;;  %2290 = vmatprep.mubr.bf16.mxu1 %v5399_v5  ;;  %v5203_v52 = vunpack.i.h.bf16 %v5201_v47  ;;  %v5202_v53 = vunpack.i.l.bf16 %v5201_v47  ;;  %v2676_v54 = vpack.c.bf16 %v2674_v48, %v2674_v48 }
 0x153   : > { %4594 = vmatprep.subr.msk.bf16.mxu0 %vm311_vm0, %v2317_v49  ;;  %4596 = vmatprep.subr.msk.bf16.mxu1 %vm311_vm0, %v2319_v50  ;;  %v2672_v49 = vsel %vm2671_vm10, %v5193_v35, %v5197_v34  ;;  %v5208_v50 = vunpack.i.h.bf16 %v5206_v46  ;;  %v4613_v34 = vld [vmem:[%s6374_s2 + $0x54] sm:$0xf] }
 0x154   : > { %3969 = vrot.lane.b32.xlu0 %v5975_v16, %s5402_s16  ;;  %v2678_v55 = vpack.c.bf16 %v2672_v49, %v2672_v49  ;;  %v2795_v57 = vsel %vm2791_vm11, %v5207_v51, %v5202_v53  ;;  %v2686_v59 = vsel %vm311_vm0, %v2676_v54, 0 }
 0x155   : > { %v2793_v56 = vsel %vm2791_vm11, %v5208_v50, %v5203_v52  ;;  %v2799_v62 = vpack.c.bf16 %v2795_v57, %v2795_v57 }
 0x156   : > { %v2692_v60 = vsel %vm311_vm0, %v2678_v55, 0  ;;  %v2797_v61 = vpack.c.bf16 %v2793_v56, %v2793_v56 }
 0x15c   : > { %4590 = vmatmul.mubr.msk.bf16.vlgmr.msra.gmra.mrb[0].mxu0 %vm307_vm3, %v4588_v63  ;;  %4592 = vmatmul.mubr.msk.bf16.vlgmr.msra.gmra.mrb[0].mxu1 %vm307_vm3, %v4588_v63  ;;  %v5216_v63 = vpop.permute.xlu1 %5215 }
 0x15d   : > { %2338 = vmatpush1.bf16.msra.mxu0 %v2326_v0  ;;  %2379 = vmatpush1.bf16.msra.mxu1 %v2332_v1  ;;  %v5211_v0 = vpop.permute.xlu0 %5210  ;;  %v2794_v1 = vsel %vm2791_vm11, %v5202_v53, %v5208_v50  ;;  %v5217_v7 = vunpack.i.l.bf16 %v5216_v63 }
 0x15e   : > { %2369 = vmatprep.mubr.bf16.mxu0 %v5399_v5  ;;  %2410 = vmatprep.mubr.bf16.mxu1 %v5399_v5  ;;  %v5213_v9 = vunpack.i.h.bf16 %v5211_v0  ;;  %v5212_v10 = vunpack.i.l.bf16 %v5211_v0  ;;  %v2796_v11 = vpack.c.bf16 %v2794_v1, %v2794_v1 }
 0x15f   : > { %4599 = vmatprep.subr.msk.bf16.mxu0 %vm311_vm0, %v2437_v3  ;;  %4601 = vmatprep.subr.msk.bf16.mxu1 %vm311_vm0, %v2439_v4  ;;  %v2792_v3 = vsel %vm2791_vm11, %v5203_v52, %v5207_v51  ;;  %v5218_v4 = vunpack.i.h.bf16 %v5216_v63  ;;  %v4618_v51 = vld [vmem:[%s6374_s2 + $0x58] sm:$0xf] }
 0x160   : > { %v2798_v12 = vpack.c.bf16 %v2792_v3, %v2792_v3  ;;  %v2915_v14 = vsel %vm2911_vm12, %v5217_v7, %v5212_v10  ;;  %v2806_v18 = vsel %vm311_vm0, %v2796_v11, 0  ;;  %v5226_v2 = vpop.permute.xlu1 %5225 }
 0x161   : > { %v2913_v13 = vsel %vm2911_vm12, %v5218_v4, %v5213_v9  ;;  %v2919_v23 = vpack.c.bf16 %v2915_v14, %v2915_v14  ;;  %v5221_v6 = vpop.permute.xlu0 %5220 }
 0x162   : > { %v2812_v19 = vsel %vm311_vm0, %v2798_v12, 0  ;;  %v2917_v22 = vpack.c.bf16 %v2913_v13, %v2913_v13  ;;  %v5222_v29 = vunpack.i.l.bf16 %v5221_v6 }
 0x164   : > { %v5236_v39 = vpop.permute.xlu1 %5235 }
 0x165   : > { %v5231_v40 = vpop.permute.xlu0 %5230 }
 0x166   : > { %v5232_v46 = vunpack.i.l.bf16 %v5231_v40 }
 0x168   : > { %4595 = vmatmul.mubr.msk.bf16.vlgmr.msra.gmra.mrb[0].mxu0 %vm307_vm3, %v4593_v24  ;;  %4597 = vmatmul.mubr.msk.bf16.vlgmr.msra.gmra.mrb[0].mxu1 %vm307_vm3, %v4593_v24  ;;  %v2914_v24 = vsel %vm2911_vm12, %v5212_v10, %v5218_v4  ;;  %v5246_v56 = vpop.permute.xlu1 %5245 }
 0x169   : > { %2458 = vmatpush1.bf16.msra.mxu0 %v2446_v25  ;;  %2499 = vmatpush1.bf16.msra.mxu1 %v2452_v26  ;;  %v2912_v25 = vsel %vm2911_vm12, %v5213_v9, %v5217_v7  ;;  %v5228_v26 = vunpack.i.h.bf16 %v5226_v2  ;;  %v2916_v30 = vpack.c.bf16 %v2914_v24, %v2914_v24  ;;  %v5241_v57 = vpop.permute.xlu0 %5240  ;;  %v4623_v7 = vld [vmem:[%s6374_s2 + $0x5c] sm:$0xf] }
 0x16a   : > { %2489 = vmatprep.mubr.bf16.mxu0 %v5399_v5  ;;  %2530 = vmatprep.mubr.bf16.mxu1 %v5399_v5  ;;  %v2918_v31 = vpack.c.bf16 %v2912_v25, %v2912_v25  ;;  %v5242_v63 = vunpack.i.l.bf16 %v5241_v57 }
 0x16b   : > { %4604 = vmatprep.subr.msk.bf16.mxu0 %vm311_vm0, %v2557_v27  ;;  %4606 = vmatprep.subr.msk.bf16.mxu1 %vm311_vm0, %v2559_v28  ;;  %v5227_v27 = vunpack.i.l.bf16 %v5226_v2  ;;  %v5223_v28 = vunpack.i.h.bf16 %v5221_v6  ;;  %v2926_v35 = vsel %vm311_vm0, %v2916_v30, 0 }
 0x16c   : > { %v2932_v36 = vsel %vm311_vm0, %v2918_v31, 0  ;;  %v5256_v13 = vpop.permute.xlu1 %5255 }
 0x16d   : > { %v3033_v32 = vsel %vm3031_vm13, %v5228_v26, %v5223_v28  ;;  %v3035_v33 = vsel %vm3031_vm13, %v5227_v27, %v5222_v29  ;;  %v5251_v14 = vpop.permute.xlu0 %5250 }
 0x16e   : > { %v3037_v37 = vpack.c.bf16 %v3033_v32, %v3033_v32  ;;  %v3039_v38 = vpack.c.bf16 %v3035_v33, %v3035_v33  ;;  %v5252_v2 = vunpack.i.l.bf16 %v5251_v14 }
 0x170   : > { %v5266_v32 = vpop.permute.xlu1 %5265 }
 0x171   : > { %v5261_v33 = vpop.permute.xlu0 %5260 }
 0x174   : > { %4600 = vmatmul.mubr.msk.bf16.vlgmr.msra.gmra.mrb[0].mxu0 %vm307_vm3, %v4598_v41  ;;  %4602 = vmatmul.mubr.msk.bf16.vlgmr.msra.gmra.mrb[0].mxu1 %vm307_vm3, %v4598_v41  ;;  %v3034_v41 = vsel %vm3031_vm13, %v5222_v29, %v5228_v26 }
 0x175   : > { %2578 = vmatpush1.bf16.msra.mxu0 %v2566_v42  ;;  %2619 = vmatpush1.bf16.msra.mxu1 %v2572_v43  ;;  %v3032_v42 = vsel %vm3031_vm13, %v5223_v28, %v5227_v27  ;;  %v5238_v43 = vunpack.i.h.bf16 %v5236_v39  ;;  %v3036_v47 = vpack.c.bf16 %v3034_v41, %v3034_v41  ;;  %v4628_v27 = vld [vmem:[%s6374_s2 + $0x60] sm:$0xf] }
 0x176   : > { %2609 = vmatprep.mubr.bf16.mxu0 %v5399_v5  ;;  %2650 = vmatprep.mubr.bf16.mxu1 %v5399_v5  ;;  %v3038_v48 = vpack.c.bf16 %v3032_v42, %v3032_v42 }
 0x177   : > { %4609 = vmatprep.subr.msk.bf16.mxu0 %vm311_vm0, %v2677_v44  ;;  %4611 = vmatprep.subr.msk.bf16.mxu1 %vm311_vm0, %v2679_v45  ;;  %v5237_v44 = vunpack.i.l.bf16 %v5236_v39  ;;  %v5233_v45 = vunpack.i.h.bf16 %v5231_v40  ;;  %v3046_v52 = vsel %vm311_vm0, %v3036_v47, 0  ;;  %v5262_v39 = vunpack.i.l.bf16 %v5261_v33 }
 0x178   : > { %v3052_v53 = vsel %vm311_vm0, %v3038_v48, 0 }
 0x179   : > { %v3153_v49 = vsel %vm3151_vm14, %v5238_v43, %v5233_v45  ;;  %v3155_v50 = vsel %vm3151_vm14, %v5237_v44, %v5232_v46 }
 0x17a   : > { %v3157_v54 = vpack.c.bf16 %v3153_v49, %v3153_v49  ;;  %v3159_v55 = vpack.c.bf16 %v3155_v50, %v3155_v50 }
 0x180   : > { %4605 = vmatmul.mubr.msk.bf16.vlgmr.msra.gmra.mrb[0].mxu0 %vm307_vm3, %v4603_v58  ;;  %4607 = vmatmul.mubr.msk.bf16.vlgmr.msra.gmra.mrb[0].mxu1 %vm307_vm3, %v4603_v58  ;;  %v3154_v58 = vsel %vm3151_vm14, %v5232_v46, %v5238_v43 }
 0x181   : > { %2698 = vmatpush1.bf16.msra.mxu0 %v2686_v59  ;;  %2739 = vmatpush1.bf16.msra.mxu1 %v2692_v60  ;;  %v3152_v59 = vsel %vm3151_vm14, %v5233_v45, %v5237_v44  ;;  %v5248_v60 = vunpack.i.h.bf16 %v5246_v56  ;;  %v3156_v0 = vpack.c.bf16 %v3154_v58, %v3154_v58  ;;  %v4633_v44 = vld [vmem:[%s6374_s2 + $0x64] sm:$0xf] }
 0x182   : > { %2729 = vmatprep.mubr.bf16.mxu0 %v5399_v5  ;;  %2770 = vmatprep.mubr.bf16.mxu1 %v5399_v5  ;;  %v3158_v1 = vpack.c.bf16 %v3152_v59, %v3152_v59 }
 0x183   : > { %4614 = vmatprep.subr.msk.bf16.mxu0 %vm311_vm0, %v2797_v61  ;;  %4616 = vmatprep.subr.msk.bf16.mxu1 %vm311_vm0, %v2799_v62  ;;  %v5247_v61 = vunpack.i.l.bf16 %v5246_v56  ;;  %v5243_v62 = vunpack.i.h.bf16 %v5241_v57  ;;  %v3166_v9 = vsel %vm311_vm0, %v3156_v0, 0  ;;  %v4643_v56 = vld [vmem:[%s6374_s2 + $0x6c] sm:$0xf]  ;;  %v3631_v0 = vpack.c.bf16 %v5985_v21, %v5985_v21 }
 0x184   : > { %v3172_v10 = vsel %vm311_vm0, %v3158_v1, 0  ;;  %v3632_v1 = vpack.c.bf16 %v5975_v16, %v5975_v16 }
 0x185   : > { %v3273_v3 = vsel %vm3271_vm15, %v5248_v60, %v5243_v62  ;;  %v3275_v4 = vsel %vm3271_vm15, %v5247_v61, %v5242_v63 }
 0x186   : > { %v3277_v11 = vpack.c.bf16 %v3273_v3, %v3273_v3  ;;  %v3279_v12 = vpack.c.bf16 %v3275_v4, %v3275_v4  ;;  %v3630_v3 = vpack.c.bf16 %v5977_v17, %v5977_v17 }
 0x18c   : > { %4610 = vmatmul.mubr.msk.bf16.vlgmr.msra.gmra.mrb[0].mxu0 %vm307_vm3, %v4608_v15  ;;  %4612 = vmatmul.mubr.msk.bf16.vlgmr.msra.gmra.mrb[0].mxu1 %vm307_vm3, %v4608_v15  ;;  %v3274_v15 = vsel %vm3271_vm15, %v5242_v63, %v5248_v60  ;;  %v3633_v63 = vpack.c.bf16 %v5981_v20, %v5981_v20 }
 0x18d   : > { %2818 = vmatpush1.bf16.msra.mxu0 %v2806_v18  ;;  %2859 = vmatpush1.bf16.msra.mxu1 %v2812_v19  ;;  %v3272_v18 = vsel %vm3271_vm15, %v5243_v62, %v5247_v61  ;;  %v5258_v19 = vunpack.i.h.bf16 %v5256_v13  ;;  %v3276_v6 = vpack.c.bf16 %v3274_v15, %v3274_v15 }
 0x18e   : > { %2849 = vmatprep.mubr.bf16.mxu0 %v5399_v5  ;;  %2890 = vmatprep.mubr.bf16.mxu1 %v5399_v5  ;;  %v3278_v24 = vpack.c.bf16 %v3272_v18, %v3272_v18 }
 0x18f   : > { %4619 = vmatprep.subr.msk.bf16.mxu0 %vm311_vm0, %v2917_v22  ;;  %4621 = vmatprep.subr.msk.bf16.mxu1 %vm311_vm0, %v2919_v23  ;;  %v5257_v22 = vunpack.i.l.bf16 %v5256_v13  ;;  %v5253_v23 = vunpack.i.h.bf16 %v5251_v14  ;;  %v3286_v28 = vsel %vm311_vm0, %v3276_v6, 0 }
 0x190   : > { %v3292_v29 = vsel %vm311_vm0, %v3278_v24, 0  ;;  %v3759_v24 = vsel %vm311_vm0, %v3632_v1, 0 }
 0x191   : > { %v3393_v25 = vsel %vm3391_vm5, %v5258_v19, %v5253_v23  ;;  %v3395_v26 = vsel %vm3391_vm5, %v5257_v22, %v5252_v2 }
 0x192   : > { %v3397_v30 = vpack.c.bf16 %v3393_v25, %v3393_v25  ;;  %v3399_v31 = vpack.c.bf16 %v3395_v26, %v3395_v26  ;;  %v3753_v25 = vsel %vm311_vm0, %v3630_v3, 0 }
 0x198   : > { %4615 = vmatmul.mubr.msk.bf16.vlgmr.msra.gmra.mrb[0].mxu0 %vm307_vm3, %v4613_v34  ;;  %4617 = vmatmul.mubr.msk.bf16.vlgmr.msra.gmra.mrb[0].mxu1 %vm307_vm3, %v4613_v34  ;;  %v3394_v34 = vsel %vm3391_vm5, %v5252_v2, %v5258_v19 }
 0x199   : > { %2938 = vmatpush1.bf16.msra.mxu0 %v2926_v35  ;;  %2979 = vmatpush1.bf16.msra.mxu1 %v2932_v36  ;;  %v3392_v35 = vsel %vm3391_vm5, %v5253_v23, %v5257_v22  ;;  %v5268_v36 = vunpack.i.h.bf16 %v5266_v32  ;;  %v3396_v40 = vpack.c.bf16 %v3394_v34, %v3394_v34  ;;  %v4648_v23 = vld [vmem:[%s6375_s3 + $0x4] sm:$0xf] }
 0x19a   : > { %2969 = vmatprep.mubr.bf16.mxu0 %v5399_v5  ;;  %3010 = vmatprep.mubr.bf16.mxu1 %v5399_v5  ;;  %v3398_v41 = vpack.c.bf16 %v3392_v35, %v3392_v35 }
 0x19b   : > { %4624 = vmatprep.subr.msk.bf16.mxu0 %vm311_vm0, %v3037_v37  ;;  %4626 = vmatprep.subr.msk.bf16.mxu1 %vm311_vm0, %v3039_v38  ;;  %v5267_v37 = vunpack.i.l.bf16 %v5266_v32  ;;  %v5263_v38 = vunpack.i.h.bf16 %v5261_v33  ;;  %v3406_v45 = vsel %vm311_vm0, %v3396_v40, 0  ;;  %v3514_v49 = vsel %vm3511_vm6, %v5262_v39, %v5268_v36 }
 0x19c   : > { %v3412_v46 = vsel %vm311_vm0, %v3398_v41, 0 }
 0x19d   : > { %v3513_v42 = vsel %vm3511_vm6, %v5268_v36, %v5263_v38  ;;  %v3515_v43 = vsel %vm3511_vm6, %v5267_v37, %v5262_v39  ;;  %v3512_v50 = vsel %vm3511_vm6, %v5263_v38, %v5267_v37  ;;  %v3623_v38 = vld [vmem:[%s6375_s3] sm:$0xf] }
 0x19e   : > { %v3517_v47 = vpack.c.bf16 %v3513_v42, %v3513_v42  ;;  %v3519_v48 = vpack.c.bf16 %v3515_v43, %v3515_v43 }
 0x1a4   : > { %4620 = vmatmul.mubr.msk.bf16.vlgmr.msra.gmra.mrb[0].mxu0 %vm307_vm3, %v4618_v51  ;;  %4622 = vmatmul.mubr.msk.bf16.vlgmr.msra.gmra.mrb[0].mxu1 %vm307_vm3, %v4618_v51  ;;  %v3516_v51 = vpack.c.bf16 %v3514_v49, %v3514_v49 }
 0x1a5   : > { %3058 = vmatpush1.bf16.msra.mxu0 %v3046_v52  ;;  %3099 = vmatpush1.bf16.msra.mxu1 %v3052_v53  ;;  %v3518_v52 = vpack.c.bf16 %v3512_v50, %v3512_v50  ;;  %v4638_v53 = vld [vmem:[%s6374_s2 + $0x68] sm:$0xf]  ;;  %v4662_v50 = vld [vmem:[%s6375_s3 + $0xc] sm:$0xf] }
 0x1a6   : > { %3089 = vmatprep.mubr.bf16.mxu0 %v5399_v5  ;;  %3130 = vmatprep.mubr.bf16.mxu1 %v5399_v5 }
 0x1a7   : > { %4629 = vmatprep.subr.msk.bf16.mxu0 %vm311_vm0, %v3157_v54  ;;  %4631 = vmatprep.subr.msk.bf16.mxu1 %vm311_vm0, %v3159_v55  ;;  %v3526_v54 = vsel %vm311_vm0, %v3516_v51, 0  ;;  %v3532_v55 = vsel %vm311_vm0, %v3518_v52, 0 }
 0x1b0   : > { %4625 = vmatmul.mubr.msk.bf16.vlgmr.msra.gmra.mrb[0].mxu0 %vm307_vm3, %v4623_v7  ;;  %4627 = vmatmul.mubr.msk.bf16.vlgmr.msra.gmra.mrb[0].mxu1 %vm307_vm3, %v4623_v7  ;;  %v5276_v57 = vpop.permute.xlu1 %5275 }
 0x1b1   : > { %3178 = vmatpush1.bf16.msra.mxu0 %v3166_v9  ;;  %3219 = vmatpush1.bf16.msra.mxu1 %v3172_v10  ;;  %v5278_v59 = vunpack.i.h.bf16 %v5276_v57  ;;  %v5277_v60 = vunpack.i.l.bf16 %v5276_v57 }
 0x1b2   : > { %3209 = vmatprep.mubr.bf16.mxu0 %v5399_v5  ;;  %3250 = vmatprep.mubr.bf16.mxu1 %v5399_v5  ;;  %v5271_v58 = vpop.permute.xlu0 %5270 }
 0x1b3   : > { %4634 = vmatprep.subr.msk.bf16.mxu0 %vm311_vm0, %v3277_v11  ;;  %4636 = vmatprep.subr.msk.bf16.mxu1 %vm311_vm0, %v3279_v12  ;;  %v5273_v61 = vunpack.i.h.bf16 %v5271_v58  ;;  %v5272_v62 = vunpack.i.l.bf16 %v5271_v58  ;;  %v3642_v9 = vsel %vm296_vm1, %v5277_v60, %v5278_v59 }
 0x1b4   : > { %v3650_v11 = vpack.c.bf16 %v3642_v9, %v3642_v9  ;;  %v5286_v16 = vpop.permute.xlu1 %5285 }
 0x1b5   : > { %v3643_v4 = vsel %vm296_vm1, %v5273_v61, %v5277_v60  ;;  %v3645_v7 = vsel %vm296_vm1, %v5278_v59, %v5272_v62  ;;  %v3644_v20 = vsel %vm296_vm1, %v5272_v62, %v5273_v61  ;;  %v5288_v14 = vunpack.i.h.bf16 %v5286_v16 }
 0x1b6   : > { %v3649_v10 = vpack.c.bf16 %v3643_v4, %v3643_v4  ;;  %v3651_v21 = vpack.c.bf16 %v3645_v7, %v3645_v7  ;;  %v3648_v12 = vpack.c.bf16 %v3644_v20, %v3644_v20  ;;  %v5287_v17 = vunpack.i.l.bf16 %v5286_v16 }
 0x1b7   : > { %v3662_v19 = vsel %vm311_vm0, %v3650_v11, 0  ;;  %vm4092_vm1 = vcmp.lt.s32.totalorder %v5590_v8, 22 }
 0x1b8   : > { %v3656_v22 = vsel %vm311_vm0, %v3648_v12, 0 }
 0x1ba   : > { %v5281_v13 = vpop.permute.xlu0 %5280 }
 0x1bb   : > { %v5283_v15 = vunpack.i.h.bf16 %v5281_v13  ;;  %v5282_v18 = vunpack.i.l.bf16 %v5281_v13 }
 0x1bc   : > { %4630 = vmatmul.mubr.msk.bf16.vlgmr.msra.gmra.mrb[0].mxu0 %vm307_vm3, %v4628_v27  ;;  %4632 = vmatmul.mubr.msk.bf16.vlgmr.msra.gmra.mrb[0].mxu1 %vm307_vm3, %v4628_v27 }
 0x1bd   : > { %3298 = vmatpush1.bf16.msra.mxu0 %v3286_v28  ;;  %3339 = vmatpush1.bf16.msra.mxu1 %v3292_v29  ;;  %v3855_v2 = vsel %vm511_vm2, %v5283_v15, %v5287_v17  ;;  %v3857_v6 = vsel %vm511_vm2, %v5288_v14, %v5282_v18  ;;  %v3968_v28 = vpop.permute.xlu1 %3967 }
 0x1be   : > { %3329 = vmatprep.mubr.bf16.mxu0 %v5399_v5  ;;  %3370 = vmatprep.mubr.bf16.mxu1 %v5399_v5  ;;  %v3861_v26 = vpack.c.bf16 %v3855_v2, %v3855_v2  ;;  %v3863_v27 = vpack.c.bf16 %v3857_v6, %v3857_v6  ;;  %v3966_v29 = vpop.permute.xlu0 %3965 }
 0x1bf   : > { %4639 = vmatprep.subr.msk.bf16.mxu0 %vm311_vm0, %v3397_v30  ;;  %4641 = vmatprep.subr.msk.bf16.mxu1 %vm311_vm0, %v3399_v31  ;;  %v3854_v30 = vsel %vm511_vm2, %v5287_v17, %v5288_v14  ;;  %v3856_v31 = vsel %vm511_vm2, %v5282_v18, %v5283_v15  ;;  %v6262_v43 = vsel %vm631_vm4, %v3966_v29, %v3968_v28  ;;  %vm4100_vm2 = vcmp.ge.s32.totalorder %v5590_v8, 22 }
 0x1c0   : > { %v3862_v34 = vpack.c.bf16 %v3854_v30, %v3854_v30  ;;  %v3860_v35 = vpack.c.bf16 %v3856_v31, %v3856_v31 }
 0x1c1   : > { %v3972_v32 = vpop.permute.xlu1 %3971 }
 0x1c2   : > { %v6241_v36 = vsel %vm631_vm4, %v3972_v32, %v3966_v29  ;;  %v3874_v39 = vsel %vm311_vm0, %v3862_v34, 0  ;;  %v3868_v40 = vsel %vm311_vm0, %v3860_v35, 0 }
 0x1c3   : > { %v3982_v41 = vpack.c.bf16 %v6241_v36, %v6241_v36 }
 0x1c6   : > { %v3970_v33 = vpop.permute.xlu0 %3969 }
 0x1c7   : > { %v6245_v37 = vsel %vm631_vm4, %v3968_v28, %v3970_v33 }
 0x1c8   : > { %4635 = vmatmul.mubr.msk.bf16.vlgmr.msra.gmra.mrb[0].mxu0 %vm307_vm3, %v4633_v44  ;;  %4637 = vmatmul.mubr.msk.bf16.vlgmr.msra.gmra.mrb[0].mxu1 %vm307_vm3, %v4633_v44  ;;  %v3980_v42 = vpack.c.bf16 %v6245_v37, %v6245_v37  ;;  %v6266_v44 = vsel %vm631_vm4, %v3970_v33, %v3972_v32  ;;  %vm4117_vm4 = vcmask 1043456  }
 0x1c9   : > { %3418 = vmatpush1.bf16.msra.mxu0 %v3406_v45  ;;  %3459 = vmatpush1.bf16.msra.mxu1 %v3412_v46  ;;  %v3979_v45 = vpack.c.bf16 %v6262_v43, %v6262_v43  ;;  %v3981_v46 = vpack.c.bf16 %v6266_v44, %v6266_v44 }
 0x1ca   : > { %3449 = vmatprep.mubr.bf16.mxu0 %v5399_v5  ;;  %3490 = vmatprep.mubr.bf16.mxu1 %v5399_v5 }
 0x1cb   : > { %4644 = vmatprep.subr.msk.bf16.mxu0 %vm311_vm0, %v3517_v47  ;;  %4646 = vmatprep.subr.msk.bf16.mxu1 %vm311_vm0, %v3519_v48  ;;  %v4657_v47 = vld [vmem:[%s6375_s3 + $0x8] sm:$0xf]  ;;  %v3987_v48 = vsel %vm311_vm0, %v3979_v45, 0  ;;  %v3993_v49 = vsel %vm311_vm0, %v3981_v46, 0 }
 0x1d4   : > { %4640 = vmatmul.mubr.msk.bf16.vlgmr.msra.gmra.mrb[0].mxu0 %vm307_vm3, %v4638_v53  ;;  %4642 = vmatmul.mubr.msk.bf16.vlgmr.msra.gmra.mrb[0].mxu1 %vm307_vm3, %v4638_v53 }
 0x1d5   : > { %3538 = vmatpush1.bf16.msra.mxu0 %v3526_v54  ;;  %3579 = vmatpush1.bf16.msra.mxu1 %v3532_v55 }
 0x1d6   : > { %3569 = vmatprep.mubr.bf16.mxu0 %v5399_v5  ;;  %3610 = vmatprep.mubr.bf16.mxu1 %v5399_v5 }
 0x1d7   : > { %4651 = vmatprep.subr.msk.bf16.mxu1 %vm311_vm0, %v3651_v21  ;;  %4649 = vmatprep.subr.msk.bf16.mxu0 %vm311_vm0, %v3649_v10 }
 0x1e0   : > { %4645 = vmatmul.mubr.msk.bf16.vlgmr.msra.gmra.mrb[0].mxu0 %vm307_vm3, %v4643_v56  ;;  %4647 = vmatmul.mubr.msk.bf16.vlgmr.msra.gmra.mrb[0].mxu1 %vm307_vm3, %v4643_v56 }
 0x1e1   : > { %3740 = vmatprep.mubr.bf16.mxu1 %v5399_v5  ;;  %3699 = vmatprep.mubr.bf16.mxu0 %v5399_v5 }
 0x1e2   : > { %3709 = vmatpush1.bf16.msra.mxu1 %v3662_v19  ;;  %3668 = vmatpush1.bf16.msra.mxu0 %v3656_v22 }
 0x1e3   : > { %4655 = vmatprep.subr.msk.bf16.mxu1 %vm311_vm0, %v3633_v63  ;;  %4653 = vmatprep.subr.msk.bf16.mxu0 %vm311_vm0, %v3631_v0 }
 0x1e8   : > { %4652 = vmatmul.mubr.msk.bf16.vlgmr.msra.gmra.mrb[4].mxu1 %vm307_vm3, %v4648_v23  ;;  %4650 = vmatmul.mubr.msk.bf16.vlgmr.msra.gmra.mrb[4].mxu0 %vm307_vm3, %v4648_v23 }
 0x1e9   : > { %3806 = vmatpush1.bf16.msra.mxu1 %v3759_v24  ;;  %3765 = vmatpush1.bf16.msra.mxu0 %v3753_v25 }
 0x1ea   : > { %3837 = vmatprep.mubr.bf16.mxu1 %v5399_v5  ;;  %3796 = vmatprep.mubr.bf16.mxu0 %v5399_v5 }
 0x1eb   : > { %4660 = vmatprep.subr.msk.bf16.mxu1 %vm311_vm0, %v3863_v27  ;;  %4658 = vmatprep.subr.msk.bf16.mxu0 %vm311_vm0, %v3861_v26 }
 0x1f4   : > { %4656 = vmatmul.mubr.msk.bf16.vlgmr.msra.gmra.mrb[4].mxu1 %vm307_vm3, %v3623_v38  ;;  %4654 = vmatmul.mubr.msk.bf16.vlgmr.msra.gmra.mrb[4].mxu0 %vm307_vm3, %v3623_v38 }
 0x1f5   : > { %3921 = vmatpush1.bf16.msra.mxu1 %v3874_v39  ;;  %3880 = vmatpush1.bf16.msra.mxu0 %v3868_v40 }
 0x1f6   : > { %3952 = vmatprep.mubr.bf16.mxu1 %v5399_v5  ;;  %3911 = vmatprep.mubr.bf16.mxu0 %v5399_v5 }
 0x1f7   : > { %4663 = vmatprep.subr.msk.bf16.mxu0 %vm311_vm0, %v3980_v42  ;;  %4665 = vmatprep.subr.msk.bf16.mxu1 %vm311_vm0, %v3982_v41 }
 0x200   : > { %4661 = vmatmul.mubr.msk.bf16.vlgmr.msra.gmra.mrb[4].mxu1 %vm307_vm3, %v4657_v47  ;;  %4659 = vmatmul.mubr.msk.bf16.vlgmr.msra.gmra.mrb[4].mxu0 %vm307_vm3, %v4657_v47 }
 0x201   : > { %3999 = vmatpush1.bf16.msra.mxu0 %v3987_v48  ;;  %4040 = vmatpush1.bf16.msra.mxu1 %v3993_v49  ;;  %v4108_v48 = vld [vmem:[%s6376_s4] sm:$0xf] }
 0x202   : > { %4071 = vmatprep.mubr.bf16.mxu1 %v5399_v5  ;;  %4030 = vmatprep.mubr.bf16.mxu0 %v5399_v5 }
 0x20c   : > { %4666 = vmatmul.mubr.msk.bf16.vlgmr.msra.gmra.mrb[4].mxu1 %vm307_vm3, %v4662_v50  ;;  %4664 = vmatmul.mubr.msk.bf16.vlgmr.msra.gmra.mrb[4].mxu0 %vm307_vm3, %v4662_v50 }
 0x20d   : > { %4203 = vmatprep.mubr.bf16.mxu1 %v5399_v5  ;;  %4162 = vmatprep.mubr.bf16.mxu0 %v5399_v5 }
 0x2b3   : > { %v3571_v51 = vpop.f32.mrb[0].mxu0  ;;  %v3612_v52 = vpop.f32.mrb[0].mxu1 }
 0x2b4   : > { %v4220_v53 = vmul.f32 0.5, %v3571_v51  ;;  %v4222_v54 = vmul.f32 0.5, %v3612_v52  ;;  %v3573_v55 = vpop.f32.mrb[1].mxu0  ;;  %v3614_v56 = vpop.f32.mrb[1].mxu1 }
 0x2b5   : > { %v5294_v57 = vpack.i.bf16 %v3612_v52, %v3573_v55  ;;  %v4221_v58 = vmul.f32 0.5, %v3573_v55  ;;  %v3575_v59 = vpop.f32.mrb[2].mxu0  ;;  %v3616_v60 = vpop.f32.mrb[2].mxu1  ;;  %v5289_v61 = vpack.i.bf16 %v3614_v56, %v3571_v51  ;;  %v4223_v0 = vmul.f32 0.5, %v3614_v56 }
 0x2b6   : > { %5303 = vtanh.f32 %v4220_v53  ;;  %v3576_v62 = vpop.f32.mrb[3].mxu0  ;;  %v3617_v63 = vpop.f32.mrb[3].mxu1 }
 0x2b7   : > { %5305 = vtanh.f32 %v4222_v54  ;;  %5295 = vrot.lane.b32.xlu1 %v5294_v57, %s5427_s9  ;;  %5290 = vrot.lane.b32.xlu0 %v5289_v61, %s5427_s9  ;;  %s5339_s9 = sshll.u32 %s5428_s17, 4  ;;  %s5340_s9 = int_to_ptr.vmem [resolvable:$false] %s5339_s9 }
 0x2b8   : > { %5307 = vtanh.f32 %v4221_v58  ;;  %s5341_s14 = scalar_lea.vmem %s5340_s9, 1024  ;;  %p5342_p0 = scmp.lt.s32.totalorder %s6328_s28, %s5340_s9 }
 0x2b9   : > { %5309 = vtanh.f32 %v4223_v0  ;;  %p5343_p1 = scmp.lt.s32.totalorder %s5341_s14, %s5335_s13 }
 0x2ba   : > { %5311 = vtanh.f32 %v3571_v51 }
 0x2bb   : > { %5313 = vtanh.f32 %v3612_v52  ;;  %p5344_p2 = por %p5343_p1, %p5342_p0 }
 0x2bc   : > { %5315 = vtanh.f32 %v3573_v55 }
 0x2bd   : > { %5317 = vtanh.f32 %v3614_v56  ;;  %p5345_p3 = pnand %p5344_p2, %p5338_p13 }
 0x2c0   : > { %v5304_v1 = vpop.eup %5303 }
 0x2c1   : > { %v5306_v3 = vpop.eup %5305  ;;  %v4228_v4 = vmul.f32 0.5, %v5304_v1 }
 0x2c2   : > { %v4230_v7 = vmul.f32 0.5, %v5306_v3  ;;  %v5308_v9 = vpop.eup %5307 }
 0x2c3   : > { %v4232_v20 = vadd.f32 0.5, %v4228_v4  ;;  %v4229_v21 = vmul.f32 0.5, %v5308_v9  ;;  %v5310_v11 = vpop.eup %5309 }
 0x2c4   : > { %v4234_v10 = vadd.f32 0.5, %v4230_v7  ;;  %v5312_v16 = vpop.eup %5311  ;;  %v4231_v17 = vmul.f32 0.5, %v5310_v11 }
 0x2c5   : > { %v4240_v12 = vrot.slane %v4232_v20, 4  ;;  %v4233_v14 = vadd.f32 0.5, %v4229_v21  ;;  %v5314_v15 = vpop.eup %5313 }
 0x2c6   : > { %v4242_v13 = vrot.slane %v4234_v10, 4  ;;  %v4235_v23 = vadd.f32 0.5, %v4231_v17  ;;  %v5316_v2 = vpop.eup %5315 }
 0x2c7   : > { %v4248_v18 = vmul.f32 %v5312_v16, %v4240_v12  ;;  %v4241_v22 = vrot.slane %v4233_v14, 4  ;;  %v5318_v25 = vpop.eup %5317 }
 0x2c8   : > { %v4250_v19 = vmul.f32 %v5314_v15, %v4242_v13  ;;  %v4243_v24 = vrot.slane %v4235_v23, 4 }
 0x2c9   : > { %4394 = vst [vmem:[%s6293_s18] sm:$0xf] %v4248_v18  ;;  %v4249_v6 = vmul.f32 %v5316_v2, %v4241_v22 }
 0x2ca   : > { %4396 = vst [vmem:[%s6293_s18 + $0x10] sm:$0xf] %v4250_v19  ;;  %v4251_v26 = vmul.f32 %v5318_v25, %v4243_v24 }
 0x2cb   : > { %4395 = vst [vmem:[%s6293_s18 + $0x8] sm:$0xf] %v4249_v6 }
 0x2cc   : > { %4397 = vst [vmem:[%s6293_s18 + $0x18] sm:$0xf] %v4251_v26 }
 0x329   : > { %v5296_v27 = vpop.permute.xlu1 %5295  ;;  %v5291_v28 = vpop.permute.xlu0 %5290 }
 0x32a   : > { %v5298_v29 = vunpack.i.h.bf16 %v5296_v27  ;;  %v5297_v30 = vunpack.i.l.bf16 %v5296_v27  ;;  %v5293_v31 = vunpack.i.h.bf16 %v5291_v28  ;;  %v5292_v32 = vunpack.i.l.bf16 %v5291_v28  ;;  %v4288_v27 = vld [vmem:[%s6377_s5] sm:$0x3] }
 0x32c   : > { %v4094_v33 = vsel %vm4092_vm1, %v5297_v30, %v5298_v29  ;;  %v4096_v34 = vsel %vm4092_vm1, %v5293_v31, %v5292_v32  ;;  %v4093_v35 = vsel %vm4092_vm1, %v5298_v29, %v5293_v31  ;;  %v4095_v38 = vsel %vm4092_vm1, %v5292_v32, %v5297_v30 }
 0x32d   : > { %v4111_v39 = vpack.c.bf16 %v4094_v33, %v4094_v33  ;;  %v4112_v40 = vpack.c.bf16 %v4093_v35, %v4093_v35  ;;  %v4110_v41 = vpack.c.bf16 %v4095_v38, %v4095_v38  ;;  %v4104_v42 = vsel %vm4100_vm2, %v4096_v34, 0.0 }
 0x32e   : > { %v4109_v46 = vpack.c.bf16 %v4104_v42, %v4104_v42 }
 0x32f   : > { %v4125_v45 = vsel %vm4117_vm4, %v4111_v39, 0  ;;  %4667 = vmatprep.subr.msk.bf16.mxu0 %vm4117_vm4, %v4110_v41  ;;  %4669 = vmatprep.subr.msk.bf16.mxu1 %vm4117_vm4, %v4112_v40 }
 0x330   : > { %4172 = vmatpush1.bf16.msra.mxu1 %v4125_v45  ;;  %v4119_v47 = vsel %vm4117_vm4, %v4109_v46, 0 }
 0x331   : > { %4131 = vmatpush1.bf16.msra.mxu0 %v4119_v47 }
 0x333   : > { %4670 = vmatmul.mubr.msk.bf16.vlgmr.msra.gmra.mrb[4].mxu1 %vm4113_vm7, %v4108_v48 }
 0x334   : > { %4668 = vmatmul.mubr.msk.bf16.vlgmr.msra.gmra.mrb[4].mxu0 %vm4113_vm7, %v4108_v48  ;;  %4381 = vmatprep.mubr.bf16.mxu1 %v5399_v5 }
 0x335   : > { %4340 = vmatprep.mubr.bf16.mxu0 %v5399_v5 }
 0x406   : > { %v4205_v8 = vpop.f32.mrb[4].mxu1 }
 0x407   : > { %v4258_v49 = vmul.f32 0.5, %v4205_v8  ;;  %v4164_v50 = vpop.f32.mrb[4].mxu0  ;;  %v4207_v51 = vpop.f32.mrb[5].mxu1 }
 0x408   : > { %v4256_v52 = vmul.f32 0.5, %v4164_v50  ;;  %v4259_v53 = vmul.f32 0.5, %v4207_v51  ;;  %v4166_v54 = vpop.f32.mrb[5].mxu0  ;;  %v4209_v55 = vpop.f32.mrb[6].mxu1 }
 0x409   : > { %5319 = vtanh.f32 %v4258_v49  ;;  %v4168_v56 = vpop.f32.mrb[6].mxu0  ;;  %v4210_v57 = vpop.f32.mrb[7].mxu1  ;;  %v4257_v58 = vmul.f32 0.5, %v4166_v54 }
 0x40a   : > { %5321 = vtanh.f32 %v4256_v52  ;;  %v4169_v59 = vpop.f32.mrb[7].mxu0 }
 0x40b   : > { %5323 = vtanh.f32 %v4259_v53 }
 0x40c   : > { %5325 = vtanh.f32 %v4257_v58 }
 0x40d   : > { %5327 = vtanh.f32 %v4205_v8 }
 0x40e   : > { %5329 = vtanh.f32 %v4164_v50 }
 0x40f   : > { %5331 = vtanh.f32 %v4207_v51 }
 0x410   : > { %5333 = vtanh.f32 %v4166_v54 }
 0x413   : > { %v5320_v5 = vpop.eup %5319 }
 0x414   : > { %v5322_v60 = vpop.eup %5321  ;;  %v4266_v61 = vmul.f32 0.5, %v5320_v5 }
 0x415   : > { %v4264_v62 = vmul.f32 0.5, %v5322_v60  ;;  %v5324_v63 = vpop.eup %5323 }
 0x416   : > { %v4270_v0 = vadd.f32 0.5, %v4266_v61  ;;  %v4267_v3 = vmul.f32 0.5, %v5324_v63  ;;  %v5326_v4 = vpop.eup %5325 }
 0x417   : > { %v4268_v1 = vadd.f32 0.5, %v4264_v62  ;;  %v5328_v9 = vpop.eup %5327  ;;  %v4265_v21 = vmul.f32 0.5, %v5326_v4 }
 0x418   : > { %v4278_v7 = vrot.slane %v4270_v0, 4  ;;  %v4271_v10 = vadd.f32 0.5, %v4267_v3  ;;  %v5330_v11 = vpop.eup %5329 }
 0x419   : > { %v4276_v20 = vrot.slane %v4268_v1, 4  ;;  %v4269_v13 = vadd.f32 0.5, %v4265_v21  ;;  %v5332_v17 = vpop.eup %5331 }
 0x41a   : > { %v4286_v12 = vmul.f32 %v5328_v9, %v4278_v7  ;;  %v4279_v16 = vrot.slane %v4271_v10, 4  ;;  %v5334_v23 = vpop.eup %5333 }
 0x41b   : > { %v4284_v14 = vmul.f32 %v5330_v11, %v4276_v20  ;;  %v4277_v18 = vrot.slane %v4269_v13, 4 }
 0x41c   : > { %v4291_v15 = vpack.c.bf16 %v4286_v12, %v4286_v12  ;;  %v4287_v19 = vmul.f32 %v5332_v17, %v4279_v16 }
 0x41d   : > { %v4289_v22 = vpack.c.bf16 %v4284_v14, %v4284_v14  ;;  %v4285_v6 = vmul.f32 %v5334_v23, %v4277_v18 }
 0x41e   : > { %v4292_v2 = vpack.c.bf16 %v4287_v19, %v4287_v19  ;;  %v4303_v24 = vsel %vm311_vm0, %v4291_v15, 0 }
 0x41f   : > { %v4290_v25 = vpack.c.bf16 %v4285_v6, %v4285_v6  ;;  %v4297_v26 = vsel %vm311_vm0, %v4289_v22, 0 }
 0x420   : > { %4673 = vmatprep.subr.msk.bf16.mxu1 %vm311_vm0, %v4292_v2 }
 0x421   : > { %4350 = vmatpush1.bf16.msra.mxu1 %v4303_v24  ;;  %4671 = vmatprep.subr.msk.bf16.mxu0 %vm311_vm0, %v4290_v25 }
 0x422   : > { %4309 = vmatpush1.bf16.msra.mxu0 %v4297_v26 }
 0x424   : > { %4674 = vmatmul.mubr.msk.bf16.vlgmr.msra.gmra.mrb[8].mxu1 %vm307_vm3, %v4288_v27 }
 0x425   : > { %4672 = vmatmul.mubr.msk.bf16.vlgmr.msra.gmra.mrb[8].mxu0 %vm307_vm3, %v4288_v27 }
 0x4f7   : > { %v4383_v28 = vpop.f32.mrb[8].mxu1 }
 0x4f8   : > { %v4392_v29 = vadd.f32 %v4383_v28, %v6266_v44  ;;  %v4385_v30 = vpop.f32.mrb[9].mxu1  ;;  %v4342_v31 = vpop.f32.mrb[8].mxu0 }
 0x4f9   : > { %v4393_v32 = vadd.f32 %v4385_v30, %v6241_v36  ;;  %v4387_v33 = vpop.f32.mrb[10].mxu1  ;;  %v4390_v35 = vadd.f32 %v4342_v31, %v6262_v43  ;;  %v4344_v38 = vpop.f32.mrb[9].mxu0 }
 0x4fa   : > { %v4404_v34 = vrot.slane %v4392_v29, 4  ;;  %v4388_v39 = vpop.f32.mrb[11].mxu1  ;;  %v4391_v44 = vadd.f32 %v4344_v38, %v6245_v37  ;;  %v4346_v41 = vpop.f32.mrb[10].mxu0 }
 0x4fb   : > { %v4405_v40 = vrot.slane %v4393_v32, 4  ;;  %v4402_v42 = vrot.slane %v4390_v35, 4  ;;  %v4347_v45 = vpop.f32.mrb[11].mxu0 }
 0x4fc   : > { %4412 = vst [vmem:[%s6293_s18 + $0x10] sm:$0xf0] %v4404_v34  ;;  %v4403_v36 = vrot.slane %v4391_v44, 4 }
 0x4fd   : > { %4413 = vst [vmem:[%s6293_s18 + $0x18] sm:$0xf0] %v4405_v40  ;;  %4410 = vst [vmem:[%s6293_s18] sm:$0xf0] %v4402_v42 }
 0x4fe   : > { %4411 = vst [vmem:[%s6293_s18 + $0x8] sm:$0xf0] %v4403_v36 }
 0x4ff   : > { %5348 = shalt.err (!%p5345_p3)
}
 0x500   : > { %s5349_s10 = scalar_lea.hbm %s6326_s12, 512  ;;  %s5353_s19 = scalar_lea.hbm %s6378_s6, 1024 }
 0x501   : > { %p5350_p4 = scmp.ne.s32.totalorder %s6326_s12, %s5349_s10  ;;  %p5354_p9 = scmp.lt.u32.totalorder %s6326_s12, %s6378_s6 }
 0x502   : > { %p5355_p10 = scmp.lt.u32.totalorder %s5353_s19, %s5349_s10  ;;  %p5357_p12 = scmp.lt.u32.totalorder %s5349_s10, %s6326_s12 }
 0x503   : > { %p5351_p7 = pnand %p5350_p4, %p5502_p5 }
 0x504   : > { %p5356_p11 = por %p5355_p10, %p5354_p9 }
 0x505   : > { %p5352_p8 = pneg %p5351_p7 }
 0x506   : > { %p5358_p13 = por %p5357_p12, %p5356_p11 }
 0x508   : > { %p5359_p0 = pnand %p5358_p13, %p5352_p8 }
 0x50a   : > { %5362 = shalt.err (!%p5359_p0)
}
 0x50b   : > { %4931 = dma.vmem_to_hbm [thread:$0]  (%p5502_p5), %s6328_s28, 512, %s6326_s12, %s4415_s25  }
 0x50c PF: > { %p4937_p1 = scmp.ge.s32.totalorder %s5397_s24, 2  ;;  %s4441_s26 = sand.u32 1, %s5385_s21  }
 0x50d   : > { %s4442_s29 = scalar_lea.sflag [#allocation3], %s4441_s26 }
 0x50e   : > { %p4934_p2 = pnand %p4937_p1, %p5506_p6 }
 0x510   : > { %5380 = dma.done.wait (!%p4934_p2), %s4442_s29, 512  }
 0x511   : > { %5382 = vsyncadd (!%p4934_p2), %s4442_s29, 4294966784  ;;  %p16_p3 = scmp.ge.s32.totalorder %s5489_s27, 4   ;;  %s6381_s21 = smov %s5389_s22 }
 0x512   : > { %s6382_s22 = smov %s5393_s23  ;;  %s6383_s23 = smov %s5500_s30 }
 0x513   : > { %s6384_s24 = smov %s5489_s27  ;;  %18 = sbr.rel (!%p16_p3) target bundleno = 3 (0x3), region = 112 }
 0x51a   :  { %4447 = vsyncpa [#allocation3], 1 }
 0x51b   :  { %4449 = vsyncpa [#allocation3 + $0x1], 1 }

</bundles_post_ra>
